<compile_context>
chip_gen: v5e
topology: v5e:2x2
jax: 0.10.0
libtpu: 0.0.40
codegen_flags: <defaults>
</compile_context>

<pallas_src>
import functools

import numpy as np
import jax
import jax.numpy as jnp
from jax import lax
from jax.experimental import pallas as pl
from jax.experimental.pallas import tpu as pltpu


# ------------------------------ fused kernel --------------------------------

def _encoder_kernel(
    x_ref,                       # (B, H, W*Ci)      f32
    m1_ref, cb1_ref,             # (K, W*Ci,  Wo1*Co1), (1, Wo1*Co1)
    m2_ref, cb2_ref,             # (K, Wo1*Co2_in, Wo2*Co2), (1, Wo2*Co2)
    m3_ref, cb3_ref,             # (K, Wo2*Co3_in, Wo3*Co3), (1, Wo3*Co3)  [pool-friendly col order]
    pw2_ref,                     # (1, Co3*PW) int32 : 2 * (lane % PW)
    w1_ref, lb1_ref,             # MLP weights (row-permuted w1) / biases
    w2_ref, lb2_ref,
    w3_ref, lb3_ref,
    w4_ref, lb4_ref,
    wm_ref, bm_ref,              # mean head
    ws_ref, bs_ref,              # std head
    eps_ref,                     # (1, 1) f32 in SMEM : scalar N(0,1) sample
    z_ref, mean_ref, std_ref, idx_ref,     # outputs
    a1_ref, a2_ref, a3_ref,      # VMEM scratch for conv activations
    *, w3_spatial, pool_k,
):
    B = x_ref.shape[0]
    K1 = m1_ref.shape[0]
    K2 = m2_ref.shape[0]
    K3 = m3_ref.shape[0]
    Ho1 = a1_ref.shape[0]
    Ho2 = a2_ref.shape[0]
    Ho3 = a3_ref.shape[0]
    half = a3_ref.shape[1] // 2          # = Co3 * PW  (dw=0 / dw=1 lane halves)
    PH = Ho3 // pool_k                   # pool_k == 2 by construction

    pw2 = pw2_ref[...]                   # (1, half) int32, hoisted out of loops

    feat_rows = []
    idx_rows = []
    for b in range(B):
        # ---- conv1 + ReLU : sum over kernel rows of a banded matmul --------
        acc = cb1_ref[...]
        for kh in range(K1):
            acc = acc + jnp.dot(x_ref[b, kh:kh + Ho1, :], m1_ref[kh],
                                preferred_element_type=jnp.float32)
        a1_ref[...] = jnp.maximum(acc, 0.0)

        # ---- conv2 + ReLU ---------------------------------------------------
        acc = cb2_ref[...]
        for kh in range(K2):
            acc = acc + jnp.dot(a1_ref[kh:kh + Ho2, :], m2_ref[kh],
                                preferred_element_type=jnp.float32)
        a2_ref[...] = jnp.maximum(acc, 0.0)

        # ---- conv3 + ReLU (columns ordered (dw, c, pw) for the pool) --------
        acc = cb3_ref[...]
        for kh in range(K3):
            acc = acc + jnp.dot(a2_ref[kh:kh + Ho3, :], m3_ref[kh],
                                preferred_element_type=jnp.float32)
        a3_ref[...] = jnp.maximum(acc, 0.0)

        # ---- 2x2 / stride-2 max-pool with PyTorch-style flat indices --------
        pooled = []
        pooled_idx = []
        for ph in range(PH):
            r0 = pool_k * ph
            r1 = r0 + 1
            v00 = a3_ref[r0:r0 + 1, 0:half]          # (1, half): (c, pw) lanes, dh=0 dw=0
            v01 = a3_ref[r0:r0 + 1, half:2 * half]   # dh=0 dw=1
            v10 = a3_ref[r1:r1 + 1, 0:half]          # dh=1 dw=0
            v11 = a3_ref[r1:r1 + 1, half:2 * half]   # dh=1 dw=1
            i00 = pw2 + (r0 * w3_spatial)
            i01 = i00 + 1
            i10 = pw2 + (r1 * w3_spatial)
            i11 = i10 + 1
            best_v, best_i = v00, i00
            for v, i in ((v01, i01), (v10, i10), (v11, i11)):
                take = v > best_v                    # strict: earliest wins ties
                best_i = jnp.where(take, i, best_i)
                best_v = jnp.where(take, v, best_v)
            pooled.append(best_v)
            pooled_idx.append(best_i)
        feat_rows.append(jnp.concatenate(pooled, axis=1))      # (1, PH*half)
        idx_rows.append(jnp.concatenate(pooled_idx, axis=1))   # (1, PH*half) i32

    feats = jnp.concatenate(feat_rows, axis=0)                 # (B, feat)
    idx_ref[...] = jnp.concatenate(idx_rows, axis=0)

    # ---- fused MLP head: one padded activation tile stays resident ---------
    h = feats
    for w_ref, b_ref in ((w1_ref, lb1_ref), (w2_ref, lb2_ref),
                         (w3_ref, lb3_ref), (w4_ref, lb4_ref)):
        h = jnp.dot(h, w_ref[...], preferred_element_type=jnp.float32) + b_ref[...]
        h = jnp.maximum(h, 0.0)

    mean = jnp.dot(h, wm_ref[...], preferred_element_type=jnp.float32) + bm_ref[...]
    std = jnp.exp(jnp.dot(h, ws_ref[...], preferred_element_type=jnp.float32)
                  + bs_ref[...])
    eps = eps_ref[0, 0]
    z_ref[...] = mean + std * eps
    mean_ref[...] = mean
    std_ref[...] = std


# ------------------ host-side (one-time) weight preparation ------------------

def _conv_row_mats(w, w_in, col_of):
    """Pack a Conv2d weight (Co,Ci,K,K) into K banded matrices M[kh] of shape
    (w_in*Ci, Wo*Co):  out[ho, col(wo,co)] = sum_kh x[ho+kh, :] @ M[kh]."""
    co_n, ci_n, kk, _ = w.shape
    wo_n = w_in - kk + 1
    idx = np.full((kk, w_in * ci_n, wo_n * co_n), w.size, dtype=np.int32)
    for kh in range(kk):
        for wo in range(wo_n):
            for kw in range(kk):
                wi = wo + kw
                for ci in range(ci_n):
                    for co in range(co_n):
                        idx[kh, wi * ci_n + ci, col_of(wo, co)] = (
                            ((co * ci_n + ci) * kk + kh) * kk + kw)
    wflat = jnp.concatenate([w.reshape(-1), jnp.zeros((1,), w.dtype)])
    return wflat[idx]


def _bias_lane(bias, col_of, wo_n):
    co_n = bias.shape[0]
    idx = np.zeros((wo_n * co_n,), np.int32)
    for wo in range(wo_n):
        for co in range(co_n):
            idx[col_of(wo, co)] = co
    return bias[idx].reshape(1, -1)


def prepare_kernel_params(params, setup, in_hw):
    H, W = in_hw
    cfgs = [setup["conv1"], setup["conv2"], setup["conv3"]]
    assert all(c["stride"] == 1 for c in cfgs)
    assert setup["pool"]["kernel_sz"] == 2 and setup["pool"]["stride"] == 2

    co1, co2, co3 = (c["out_ch"] for c in cfgs)
    k1, k2, k3 = (c["kernel_sz"] for c in cfgs)
    ho1, wo1 = H - k1 + 1, W - k1 + 1
    ho2, wo2 = ho1 - k2 + 1, wo1 - k2 + 1
    ho3, wo3 = ho2 - k3 + 1, wo2 - k3 + 1
    ph_n, pw_n = ho3 // 2, wo3 // 2
    half = co3 * pw_n

    col_a = lambda wo, co: wo * co1 + co
    col_b = lambda wo, co: wo * co2 + co
    # conv3 columns ordered (dw, c, pw) so the max-pool is two lane halves.
    col_c = lambda wo, co: (wo % 2) * half + co * pw_n + (wo // 2)

    kp = {
        "m1": _conv_row_mats(params["conv1_w"], W, col_a),
        "cb1": _bias_lane(params["conv1_b"], col_a, wo1),
        "m2": _conv_row_mats(params["conv2_w"], wo1, col_b),
        "cb2": _bias_lane(params["conv2_b"], col_b, wo2),
        "m3": _conv_row_mats(params["conv3_w"], wo2, col_c),
        "cb3": _bias_lane(params["conv3_b"], col_c, wo3),
        "pw2": jnp.asarray(2 * (np.arange(half) % pw_n),
                           jnp.int32).reshape(1, half),
    }

    # linear1 rows: PyTorch flatten order (c, ph, pw) -> kernel lane order (ph, c, pw)
    n_feat = co3 * ph_n * pw_n
    perm = np.empty((n_feat,), np.int32)
    for l in range(n_feat):
        ph = l // (co3 * pw_n)
        c = (l // pw_n) % co3
        pw = l % pw_n
        perm[l] = c * (ph_n * pw_n) + ph * pw_n + pw
    kp["w1"] = params["lin1_w"][perm, :]
    kp["lb1"] = params["lin1_b"].reshape(1, -1)
    for i in (2, 3, 4):
        kp[f"w{i}"] = params[f"lin{i}_w"]
        kp[f"lb{i}"] = params[f"lin{i}_b"].reshape(1, -1)
    kp["wm"] = params["mean_w"]
    kp["bm"] = params["mean_b"].reshape(1, -1)
    kp["ws"] = params["std_w"]
    kp["bs"] = params["std_b"].reshape(1, -1)

    kp["dims"] = dict(H=H, W=W, Ci=cfgs[0]["in_ch"],
                      Ho1=ho1, L1=wo1 * co1,
                      Ho2=ho2, L2=wo2 * co2,
                      Ho3=ho3, L3=wo3 * co3, Wo3=wo3,
                      C3=co3, PH=ph_n, PW=pw_n, pool_k=2)
    return kp


# ------------------------------ forward wrappers -----------------------------

def conv_encoder_forward_pallas(kp, x_nchw, eps):
    d = kp["dims"]
    B = x_nchw.shape[0]
    # NCHW -> (B, H, W*Ci) with lane index w*Ci + ci
    x_in = jnp.transpose(x_nchw, (0, 2, 3, 1)).reshape(
        B, d["H"], d["W"] * d["Ci"]).astype(jnp.float32)
    eps2 = jnp.asarray(eps, jnp.float32).reshape(1, 1)

    vm = pl.BlockSpec(memory_space=pltpu.MemorySpace.VMEM)
    sm = pl.BlockSpec(memory_space=pltpu.MemorySpace.SMEM)
    latent = kp["wm"].shape[1]
    n_feat = d["C3"] * d["PH"] * d["PW"]

    kernel = functools.partial(_encoder_kernel,
                               w3_spatial=d["Wo3"], pool_k=d["pool_k"])
    z, mean, std, idx_flat = pl.pallas_call(
        kernel,
        out_shape=(
            jax.ShapeDtypeStruct((B, latent), jnp.float32),
            jax.ShapeDtypeStruct((B, latent), jnp.float32),
            jax.ShapeDtypeStruct((B, latent), jnp.float32),
            jax.ShapeDtypeStruct((B, n_feat), jnp.int32),
        ),
        in_specs=[vm] * 20 + [sm],
        out_specs=(vm, vm, vm, vm),
        scratch_shapes=[
            pltpu.VMEM((d["Ho1"], d["L1"]), jnp.float32),
            pltpu.VMEM((d["Ho2"], d["L2"]), jnp.float32),
            pltpu.VMEM((d["Ho3"], d["L3"]), jnp.float32),
        ],
    )(
        x_in,
        kp["m1"], kp["cb1"], kp["m2"], kp["cb2"], kp["m3"], kp["cb3"],
        kp["pw2"],
        kp["w1"], kp["lb1"], kp["w2"], kp["lb2"],
        kp["w3"], kp["lb3"], kp["w4"], kp["lb4"],
        kp["wm"], kp["bm"], kp["ws"], kp["bs"],
        eps2,
    )
    # kernel index layout (ph, c, pw) -> PyTorch (B, C, PH, PW)
    idx = idx_flat.reshape(B, d["PH"], d["C3"], d["PW"]).transpose(0, 2, 1, 3)
    return z, mean, std, idx


def _ref_maxpool2x2(h):
    B, C, H, W = h.shape
    hw = h.reshape(B, C, H // 2, 2, W // 2, 2)
    hw = jnp.transpose(hw, (0, 1, 2, 4, 3, 5)).reshape(B, C, H // 2, W // 2, 4)
    pooled = hw.max(axis=-1)
    arg = jnp.argmax(hw, axis=-1)            # first max on ties
    dh, dw = arg // 2, arg % 2
    ph = jnp.arange(H // 2).reshape(1, 1, -1, 1)
    pw = jnp.arange(W // 2).reshape(1, 1, 1, -1)
    idx = (2 * ph + dh) * W + (2 * pw + dw)
    return pooled, idx.astype(jnp.int32)


def conv_encoder_forward_ref(params, x, eps):
    h = x
    for i in (1, 2, 3):
        h = lax.conv_general_dilated(h, params[f"conv{i}_w"], (1, 1), "VALID",
                                     dimension_numbers=("NCHW", "OIHW", "NCHW"))
        h = jnp.maximum(h + params[f"conv{i}_b"].reshape(1, -1, 1, 1), 0.0)
    pooled, idx = _ref_maxpool2x2(h)
    hh = pooled.reshape(x.shape[0], -1)                   # torch.flatten(x, 1)
    for i in (1, 2, 3, 4):
        hh = jnp.maximum(hh @ params[f"lin{i}_w"] + params[f"lin{i}_b"], 0.0)
    mean = hh @ params["mean_w"] + params["mean_b"]
    std = jnp.exp(hh @ params["std_w"] + params["std_b"])
    z = mean + std * eps
    return z, mean, std, idx


# -------------------------------- param init ---------------------------------

def init_params(key, latent_dims, setup):
    params = {}
    ks = jax.random.split(key, 9)

    def dense(k, fin, fout):
        kw, kb = jax.random.split(k)
        return (jax.random.normal(kw, (fin, fout), jnp.float32) / np.sqrt(fin),
                0.01 * jax.random.normal(kb, (fout,), jnp.float32))

    def conv(k, ci, co, ksz):
        kw, kb = jax.random.split(k)
        return (jax.random.normal(kw, (co, ci, ksz, ksz), jnp.float32)
                / np.sqrt(ci * ksz * ksz),
                0.01 * jax.random.normal(kb, (co,), jnp.float32))

    for i in (1, 2, 3):
        c = setup[f"conv{i}"]
        w, b = conv(ks[i - 1], c["in_ch"], c["out_ch"], c["kernel_sz"])
        params[f"conv{i}_w"], params[f"conv{i}_b"] = w, b
    for i in (1, 2, 3, 4):
        ln = setup[f"ln{i}"]
        w, b = dense(ks[2 + i], ln["in_feat"], ln["out_feat"])
        params[f"lin{i}_w"], params[f"lin{i}_b"] = w, b
    w, b = dense(ks[7], setup["mean_ln"]["in_feat"], latent_dims)
    params["mean_w"], params["mean_b"] = w, b
    w, b = dense(ks[8], setup["std_ln"]["in_feat"], latent_dims)
    params["std_w"], params["std_b"] = w, b
    return params


# ----------------------------------- main ------------------------------------

if __name__ == "__main__":
    latent_dims = 8
    encoder_setup = {
        "conv1": {"in_ch": 1, "out_ch": 4, "kernel_sz": 3, "stride": 1},
        "conv2": {"in_ch": 4, "out_ch": 8, "kernel_sz": 3, "stride": 1},
        "conv3": {"in_ch": 8, "out_ch": 4, "kernel_sz": 3, "stride": 1},
        "pool": {"kernel_sz": 2, "stride": 2},
        "ln1": {"in_feat": 64, "out_feat": 128},
        "ln2": {"in_feat": 128, "out_feat": 64},
        "ln3": {"in_feat": 64, "out_feat": 32},
        "ln4": {"in_feat": 32, "out_feat": 16},
        "mean_ln": {"in_feat": 16},
        "std_ln": {"in_feat": 16},
    }
    B, H, W = 2, 14, 14

    key = jax.random.PRNGKey(0)
    k_param, k_x, k_eps = jax.random.split(key, 3)
    params = init_params(k_param, latent_dims, encoder_setup)
    x = jax.random.normal(k_x, (B, encoder_setup["conv1"]["in_ch"], H, W),
                          jnp.float32)
    # Scalar N(0,1) sample (torch.distributions.Normal(0,1).sample()), drawn
    # outside the kernel so both paths are deterministic and comparable.
    eps = jax.random.normal(k_eps, (), jnp.float32)

    kp = prepare_kernel_params(params, encoder_setup, (H, W))
    fwd = jax.jit(lambda xx, ee: conv_encoder_forward_pallas(kp, xx, ee))
    z, mean, std, idx = jax.block_until_ready(fwd(x, eps))

    ref = jax.jit(lambda xx, ee: conv_encoder_forward_ref(params, xx, ee))
    z_r, mean_r, std_r, idx_r = jax.block_until_ready(ref(x, eps))

    assert z.shape == (B, latent_dims), z.shape
    assert idx.shape == (B, 4, 4, 4), idx.shape
    np.testing.assert_allclose(np.asarray(mean), np.asarray(mean_r),
                               rtol=1e-4, atol=1e-4)
    np.testing.assert_allclose(np.asarray(std), np.asarray(std_r),
                               rtol=1e-4, atol=1e-4)
    np.testing.assert_allclose(np.asarray(z), np.asarray(z_r),
                               rtol=1e-4, atol=1e-4)
    np.testing.assert_array_equal(np.asarray(idx), np.asarray(idx_r))
    print("KERNEL_OK")
</pallas_src>

<mosaic_0001>
module attributes {stable_mosaic.version = 11 : i64} {
  func.func @_encoder_kernel(%arg0: memref<2x14x14xf32, #tpu.memory_space<vmem>>, %arg1: memref<3x14x48xf32, #tpu.memory_space<vmem>>, %arg2: memref<1x48xf32, #tpu.memory_space<vmem>>, %arg3: memref<3x48x80xf32, #tpu.memory_space<vmem>>, %arg4: memref<1x80xf32, #tpu.memory_space<vmem>>, %arg5: memref<3x80x32xf32, #tpu.memory_space<vmem>>, %arg6: memref<1x32xf32, #tpu.memory_space<vmem>>, %arg7: memref<1x16xi32, #tpu.memory_space<vmem>>, %arg8: memref<64x128xf32, #tpu.memory_space<vmem>>, %arg9: memref<1x128xf32, #tpu.memory_space<vmem>>, %arg10: memref<128x64xf32, #tpu.memory_space<vmem>>, %arg11: memref<1x64xf32, #tpu.memory_space<vmem>>, %arg12: memref<64x32xf32, #tpu.memory_space<vmem>>, %arg13: memref<1x32xf32, #tpu.memory_space<vmem>>, %arg14: memref<32x16xf32, #tpu.memory_space<vmem>>, %arg15: memref<1x16xf32, #tpu.memory_space<vmem>>, %arg16: memref<16x8xf32, #tpu.memory_space<vmem>>, %arg17: memref<1x8xf32, #tpu.memory_space<vmem>>, %arg18: memref<16x8xf32, #tpu.memory_space<vmem>>, %arg19: memref<1x8xf32, #tpu.memory_space<vmem>>, %arg20: memref<1x1xf32, #tpu.memory_space<smem>>, %arg21: memref<2x8xf32, #tpu.memory_space<vmem>>, %arg22: memref<2x8xf32, #tpu.memory_space<vmem>>, %arg23: memref<2x8xf32, #tpu.memory_space<vmem>>, %arg24: memref<2x64xi32, #tpu.memory_space<vmem>>, %arg25: memref<12x48xf32, #tpu.memory_space<vmem>>, %arg26: memref<10x80xf32, #tpu.memory_space<vmem>>, %arg27: memref<8x32xf32, #tpu.memory_space<vmem>>) attributes {dimension_semantics = [], scalar_prefetch = 0 : i64, scratch_operands = 3 : i64, tpu.core_type = #tpu.core_type<tc>} {
    %c0 = arith.constant 0 : index
    %c0_0 = arith.constant 0 : index
    %0 = vector.load %arg7[%c0, %c0_0] : memref<1x16xi32, #tpu.memory_space<vmem>>, vector<1x16xi32>
    %c0_1 = arith.constant 0 : index
    %c0_2 = arith.constant 0 : index
    %1 = vector.load %arg2[%c0_1, %c0_2] : memref<1x48xf32, #tpu.memory_space<vmem>>, vector<1x48xf32>
    %c0_3 = arith.constant 0 : index
    %c0_4 = arith.constant 0 : index
    %c0_5 = arith.constant 0 : index
    %2 = vector.load %arg0[%c0_3, %c0_4, %c0_5] : memref<2x14x14xf32, #tpu.memory_space<vmem>>, vector<1x12x14xf32>
    %3 = vector.shape_cast %2 : vector<1x12x14xf32> to vector<12x14xf32>
    %c0_6 = arith.constant 0 : index
    %c0_7 = arith.constant 0 : index
    %c0_8 = arith.constant 0 : index
    %4 = vector.load %arg1[%c0_6, %c0_7, %c0_8] : memref<3x14x48xf32, #tpu.memory_space<vmem>>, vector<1x14x48xf32>
    %5 = vector.shape_cast %4 : vector<1x14x48xf32> to vector<14x48xf32>
    %cst = arith.constant dense<0.000000e+00> : vector<12x48xf32>
    %6 = tpu.matmul %3, %5, %cst {dimension_numbers = #tpu.dot_dimension_numbers<[1], [0], [0], [1], [0, 0, 1, 1], [], []>} : vector<12x14xf32>, vector<14x48xf32>, vector<12x48xf32> -> vector<12x48xf32>
    %7 = vector.broadcast %1 : vector<1x48xf32> to vector<12x48xf32>
    %8 = arith.addf %7, %6 : vector<12x48xf32>
    %c0_9 = arith.constant 0 : index
    %c1 = arith.constant 1 : index
    %c0_10 = arith.constant 0 : index
    %9 = vector.load %arg0[%c0_9, %c1, %c0_10] : memref<2x14x14xf32, #tpu.memory_space<vmem>>, vector<1x12x14xf32>
    %10 = vector.shape_cast %9 : vector<1x12x14xf32> to vector<12x14xf32>
    %c1_11 = arith.constant 1 : index
    %c0_12 = arith.constant 0 : index
    %c0_13 = arith.constant 0 : index
    %11 = vector.load %arg1[%c1_11, %c0_12, %c0_13] : memref<3x14x48xf32, #tpu.memory_space<vmem>>, vector<1x14x48xf32>
    %12 = vector.shape_cast %11 : vector<1x14x48xf32> to vector<14x48xf32>
    %cst_14 = arith.constant dense<0.000000e+00> : vector<12x48xf32>
    %13 = tpu.matmul %10, %12, %cst_14 {dimension_numbers = #tpu.dot_dimension_numbers<[1], [0], [0], [1], [0, 0, 1, 1], [], []>} : vector<12x14xf32>, vector<14x48xf32>, vector<12x48xf32> -> vector<12x48xf32>
    %14 = arith.addf %8, %13 : vector<12x48xf32>
    %c0_15 = arith.constant 0 : index
    %c2 = arith.constant 2 : index
    %c0_16 = arith.constant 0 : index
    %15 = vector.load %arg0[%c0_15, %c2, %c0_16] : memref<2x14x14xf32, #tpu.memory_space<vmem>>, vector<1x12x14xf32>
    %16 = vector.shape_cast %15 : vector<1x12x14xf32> to vector<12x14xf32>
    %c2_17 = arith.constant 2 : index
    %c0_18 = arith.constant 0 : index
    %c0_19 = arith.constant 0 : index
    %17 = vector.load %arg1[%c2_17, %c0_18, %c0_19] : memref<3x14x48xf32, #tpu.memory_space<vmem>>, vector<1x14x48xf32>
    %18 = vector.shape_cast %17 : vector<1x14x48xf32> to vector<14x48xf32>
    %cst_20 = arith.constant dense<0.000000e+00> : vector<12x48xf32>
    %19 = tpu.matmul %16, %18, %cst_20 {dimension_numbers = #tpu.dot_dimension_numbers<[1], [0], [0], [1], [0, 0, 1, 1], [], []>} : vector<12x14xf32>, vector<14x48xf32>, vector<12x48xf32> -> vector<12x48xf32>
    %20 = arith.addf %14, %19 : vector<12x48xf32>
    %cst_21 = arith.constant 0.000000e+00 : f32
    %21 = vector.broadcast %cst_21 : f32 to vector<12x48xf32>
    %22 = arith.maximumf %20, %21 : vector<12x48xf32>
    %c0_22 = arith.constant 0 : index
    %c0_23 = arith.constant 0 : index
    %23 = vector.load %arg25[%c0_22, %c0_23] : memref<12x48xf32, #tpu.memory_space<vmem>>, vector<12x48xf32>
    tpu.vector_store %arg25[%c0_22, %c0_23], %22 {strides = array<i32>} : memref<12x48xf32, #tpu.memory_space<vmem>>, vector<12x48xf32>,
    %c0_24 = arith.constant 0 : index
    %c0_25 = arith.constant 0 : index
    %24 = vector.load %arg4[%c0_24, %c0_25] : memref<1x80xf32, #tpu.memory_space<vmem>>, vector<1x80xf32>
    %c0_26 = arith.constant 0 : index
    %c0_27 = arith.constant 0 : index
    %25 = vector.load %arg25[%c0_26, %c0_27] : memref<12x48xf32, #tpu.memory_space<vmem>>, vector<10x48xf32>
    %c0_28 = arith.constant 0 : index
    %c0_29 = arith.constant 0 : index
    %c0_30 = arith.constant 0 : index
    %26 = vector.load %arg3[%c0_28, %c0_29, %c0_30] : memref<3x48x80xf32, #tpu.memory_space<vmem>>, vector<1x48x80xf32>
    %27 = vector.shape_cast %26 : vector<1x48x80xf32> to vector<48x80xf32>
    %cst_31 = arith.constant dense<0.000000e+00> : vector<10x80xf32>
    %28 = tpu.matmul %25, %27, %cst_31 {dimension_numbers = #tpu.dot_dimension_numbers<[1], [0], [0], [1], [0, 0, 1, 1], [], []>} : vector<10x48xf32>, vector<48x80xf32>, vector<10x80xf32> -> vector<10x80xf32>
    %29 = vector.broadcast %24 : vector<1x80xf32> to vector<10x80xf32>
    %30 = arith.addf %29, %28 : vector<10x80xf32>
    %c1_32 = arith.constant 1 : index
    %c0_33 = arith.constant 0 : index
    %31 = vector.load %arg25[%c1_32, %c0_33] : memref<12x48xf32, #tpu.memory_space<vmem>>, vector<10x48xf32>
    %c1_34 = arith.constant 1 : index
    %c0_35 = arith.constant 0 : index
    %c0_36 = arith.constant 0 : index
    %32 = vector.load %arg3[%c1_34, %c0_35, %c0_36] : memref<3x48x80xf32, #tpu.memory_space<vmem>>, vector<1x48x80xf32>
    %33 = vector.shape_cast %32 : vector<1x48x80xf32> to vector<48x80xf32>
    %cst_37 = arith.constant dense<0.000000e+00> : vector<10x80xf32>
    %34 = tpu.matmul %31, %33, %cst_37 {dimension_numbers = #tpu.dot_dimension_numbers<[1], [0], [0], [1], [0, 0, 1, 1], [], []>} : vector<10x48xf32>, vector<48x80xf32>, vector<10x80xf32> -> vector<10x80xf32>
    %35 = arith.addf %30, %34 : vector<10x80xf32>
    %c2_38 = arith.constant 2 : index
    %c0_39 = arith.constant 0 : index
    %36 = vector.load %arg25[%c2_38, %c0_39] : memref<12x48xf32, #tpu.memory_space<vmem>>, vector<10x48xf32>
    %c2_40 = arith.constant 2 : index
    %c0_41 = arith.constant 0 : index
    %c0_42 = arith.constant 0 : index
    %37 = vector.load %arg3[%c2_40, %c0_41, %c0_42] : memref<3x48x80xf32, #tpu.memory_space<vmem>>, vector<1x48x80xf32>
    %38 = vector.shape_cast %37 : vector<1x48x80xf32> to vector<48x80xf32>
    %cst_43 = arith.constant dense<0.000000e+00> : vector<10x80xf32>
    %39 = tpu.matmul %36, %38, %cst_43 {dimension_numbers = #tpu.dot_dimension_numbers<[1], [0], [0], [1], [0, 0, 1, 1], [], []>} : vector<10x48xf32>, vector<48x80xf32>, vector<10x80xf32> -> vector<10x80xf32>
    %40 = arith.addf %35, %39 : vector<10x80xf32>
    %cst_44 = arith.constant 0.000000e+00 : f32
    %41 = vector.broadcast %cst_44 : f32 to vector<10x80xf32>
    %42 = arith.maximumf %40, %41 : vector<10x80xf32>
    %c0_45 = arith.constant 0 : index
    %c0_46 = arith.constant 0 : index
    %43 = vector.load %arg26[%c0_45, %c0_46] : memref<10x80xf32, #tpu.memory_space<vmem>>, vector<10x80xf32>
    tpu.vector_store %arg26[%c0_45, %c0_46], %42 {strides = array<i32>} : memref<10x80xf32, #tpu.memory_space<vmem>>, vector<10x80xf32>,
    %c0_47 = arith.constant 0 : index
    %c0_48 = arith.constant 0 : index
    %44 = vector.load %arg6[%c0_47, %c0_48] : memref<1x32xf32, #tpu.memory_space<vmem>>, vector<1x32xf32>
    %c0_49 = arith.constant 0 : index
    %c0_50 = arith.constant 0 : index
    %45 = vector.load %arg26[%c0_49, %c0_50] : memref<10x80xf32, #tpu.memory_space<vmem>>, vector<8x80xf32>
    %c0_51 = arith.constant 0 : index
    %c0_52 = arith.constant 0 : index
    %c0_53 = arith.constant 0 : index
    %46 = vector.load %arg5[%c0_51, %c0_52, %c0_53] : memref<3x80x32xf32, #tpu.memory_space<vmem>>, vector<1x80x32xf32>
    %47 = vector.shape_cast %46 : vector<1x80x32xf32> to vector<80x32xf32>
    %cst_54 = arith.constant dense<0.000000e+00> : vector<8x32xf32>
    %48 = tpu.matmul %45, %47, %cst_54 {dimension_numbers = #tpu.dot_dimension_numbers<[1], [0], [0], [1], [0, 0, 1, 1], [], []>} : vector<8x80xf32>, vector<80x32xf32>, vector<8x32xf32> -> vector<8x32xf32>
    %49 = vector.broadcast %44 : vector<1x32xf32> to vector<8x32xf32>
    %50 = arith.addf %49, %48 : vector<8x32xf32>
    %c1_55 = arith.constant 1 : index
    %c0_56 = arith.constant 0 : index
    %51 = vector.load %arg26[%c1_55, %c0_56] : memref<10x80xf32, #tpu.memory_space<vmem>>, vector<8x80xf32>
    %c1_57 = arith.constant 1 : index
    %c0_58 = arith.constant 0 : index
    %c0_59 = arith.constant 0 : index
    %52 = vector.load %arg5[%c1_57, %c0_58, %c0_59] : memref<3x80x32xf32, #tpu.memory_space<vmem>>, vector<1x80x32xf32>
    %53 = vector.shape_cast %52 : vector<1x80x32xf32> to vector<80x32xf32>
    %cst_60 = arith.constant dense<0.000000e+00> : vector<8x32xf32>
    %54 = tpu.matmul %51, %53, %cst_60 {dimension_numbers = #tpu.dot_dimension_numbers<[1], [0], [0], [1], [0, 0, 1, 1], [], []>} : vector<8x80xf32>, vector<80x32xf32>, vector<8x32xf32> -> vector<8x32xf32>
    %55 = arith.addf %50, %54 : vector<8x32xf32>
    %c2_61 = arith.constant 2 : index
    %c0_62 = arith.constant 0 : index
    %56 = vector.load %arg26[%c2_61, %c0_62] : memref<10x80xf32, #tpu.memory_space<vmem>>, vector<8x80xf32>
    %c2_63 = arith.constant 2 : index
    %c0_64 = arith.constant 0 : index
    %c0_65 = arith.constant 0 : index
    %57 = vector.load %arg5[%c2_63, %c0_64, %c0_65] : memref<3x80x32xf32, #tpu.memory_space<vmem>>, vector<1x80x32xf32>
    %58 = vector.shape_cast %57 : vector<1x80x32xf32> to vector<80x32xf32>
    %cst_66 = arith.constant dense<0.000000e+00> : vector<8x32xf32>
    %59 = tpu.matmul %56, %58, %cst_66 {dimension_numbers = #tpu.dot_dimension_numbers<[1], [0], [0], [1], [0, 0, 1, 1], [], []>} : vector<8x80xf32>, vector<80x32xf32>, vector<8x32xf32> -> vector<8x32xf32>
    %60 = arith.addf %55, %59 : vector<8x32xf32>
    %cst_67 = arith.constant 0.000000e+00 : f32
    %61 = vector.broadcast %cst_67 : f32 to vector<8x32xf32>
    %62 = arith.maximumf %60, %61 : vector<8x32xf32>
    %c0_68 = arith.constant 0 : index
    %c0_69 = arith.constant 0 : index
    %63 = vector.load %arg27[%c0_68, %c0_69] : memref<8x32xf32, #tpu.memory_space<vmem>>, vector<8x32xf32>
    tpu.vector_store %arg27[%c0_68, %c0_69], %62 {strides = array<i32>} : memref<8x32xf32, #tpu.memory_space<vmem>>, vector<8x32xf32>,
    %c0_70 = arith.constant 0 : index
    %c0_71 = arith.constant 0 : index
    %64 = vector.load %arg27[%c0_70, %c0_71] : memref<8x32xf32, #tpu.memory_space<vmem>>, vector<1x16xf32>
    %c0_72 = arith.constant 0 : index
    %c16 = arith.constant 16 : index
    %65 = vector.load %arg27[%c0_72, %c16] : memref<8x32xf32, #tpu.memory_space<vmem>>, vector<1x16xf32>
    %c1_73 = arith.constant 1 : index
    %c0_74 = arith.constant 0 : index
    %66 = vector.load %arg27[%c1_73, %c0_74] : memref<8x32xf32, #tpu.memory_space<vmem>>, vector<1x16xf32>
    %c1_75 = arith.constant 1 : index
    %c16_76 = arith.constant 16 : index
    %67 = vector.load %arg27[%c1_75, %c16_76] : memref<8x32xf32, #tpu.memory_space<vmem>>, vector<1x16xf32>
    %c0_i32 = arith.constant 0 : i32
    %68 = vector.broadcast %c0_i32 : i32 to vector<1x16xi32>
    %69 = arith.addi %0, %68 : vector<1x16xi32>
    %c1_i32 = arith.constant 1 : i32
    %70 = vector.broadcast %c1_i32 : i32 to vector<1x16xi32>
    %71 = arith.addi %69, %70 : vector<1x16xi32>
    %c8_i32 = arith.constant 8 : i32
    %72 = vector.broadcast %c8_i32 : i32 to vector<1x16xi32>
    %73 = arith.addi %0, %72 : vector<1x16xi32>
    %c1_i32_77 = arith.constant 1 : i32
    %74 = vector.broadcast %c1_i32_77 : i32 to vector<1x16xi32>
    %75 = arith.addi %73, %74 : vector<1x16xi32>
    %76 = arith.cmpf ogt, %65, %64 : vector<1x16xf32>
    %77 = arith.select %76, %71, %69 : vector<1x16xi1>, vector<1x16xi32>
    %78 = arith.select %76, %65, %64 : vector<1x16xi1>, vector<1x16xf32>
    %79 = arith.cmpf ogt, %66, %78 : vector<1x16xf32>
    %80 = arith.select %79, %73, %77 : vector<1x16xi1>, vector<1x16xi32>
    %81 = arith.select %79, %66, %78 : vector<1x16xi1>, vector<1x16xf32>
    %82 = arith.cmpf ogt, %67, %81 : vector<1x16xf32>
    %83 = arith.select %82, %75, %80 : vector<1x16xi1>, vector<1x16xi32>
    %84 = arith.select %82, %67, %81 : vector<1x16xi1>, vector<1x16xf32>
    %c2_78 = arith.constant 2 : index
    %c0_79 = arith.constant 0 : index
    %85 = vector.load %arg27[%c2_78, %c0_79] : memref<8x32xf32, #tpu.memory_space<vmem>>, vector<1x16xf32>
    %c2_80 = arith.constant 2 : index
    %c16_81 = arith.constant 16 : index
    %86 = vector.load %arg27[%c2_80, %c16_81] : memref<8x32xf32, #tpu.memory_space<vmem>>, vector<1x16xf32>
    %c3 = arith.constant 3 : index
    %c0_82 = arith.constant 0 : index
    %87 = vector.load %arg27[%c3, %c0_82] : memref<8x32xf32, #tpu.memory_space<vmem>>, vector<1x16xf32>
    %c3_83 = arith.constant 3 : index
    %c16_84 = arith.constant 16 : index
    %88 = vector.load %arg27[%c3_83, %c16_84] : memref<8x32xf32, #tpu.memory_space<vmem>>, vector<1x16xf32>
    %c16_i32 = arith.constant 16 : i32
    %89 = vector.broadcast %c16_i32 : i32 to vector<1x16xi32>
    %90 = arith.addi %0, %89 : vector<1x16xi32>
    %c1_i32_85 = arith.constant 1 : i32
    %91 = vector.broadcast %c1_i32_85 : i32 to vector<1x16xi32>
    %92 = arith.addi %90, %91 : vector<1x16xi32>
    %c24_i32 = arith.constant 24 : i32
    %93 = vector.broadcast %c24_i32 : i32 to vector<1x16xi32>
    %94 = arith.addi %0, %93 : vector<1x16xi32>
    %c1_i32_86 = arith.constant 1 : i32
    %95 = vector.broadcast %c1_i32_86 : i32 to vector<1x16xi32>
    %96 = arith.addi %94, %95 : vector<1x16xi32>
    %97 = arith.cmpf ogt, %86, %85 : vector<1x16xf32>
    %98 = arith.select %97, %92, %90 : vector<1x16xi1>, vector<1x16xi32>
    %99 = arith.select %97, %86, %85 : vector<1x16xi1>, vector<1x16xf32>
    %100 = arith.cmpf ogt, %87, %99 : vector<1x16xf32>
    %101 = arith.select %100, %94, %98 : vector<1x16xi1>, vector<1x16xi32>
    %102 = arith.select %100, %87, %99 : vector<1x16xi1>, vector<1x16xf32>
    %103 = arith.cmpf ogt, %88, %102 : vector<1x16xf32>
    %104 = arith.select %103, %96, %101 : vector<1x16xi1>, vector<1x16xi32>
    %105 = arith.select %103, %88, %102 : vector<1x16xi1>, vector<1x16xf32>
    %c4 = arith.constant 4 : index
    %c0_87 = arith.constant 0 : index
    %106 = vector.load %arg27[%c4, %c0_87] : memref<8x32xf32, #tpu.memory_space<vmem>>, vector<1x16xf32>
    %c4_88 = arith.constant 4 : index
    %c16_89 = arith.constant 16 : index
    %107 = vector.load %arg27[%c4_88, %c16_89] : memref<8x32xf32, #tpu.memory_space<vmem>>, vector<1x16xf32>
    %c5 = arith.constant 5 : index
    %c0_90 = arith.constant 0 : index
    %108 = vector.load %arg27[%c5, %c0_90] : memref<8x32xf32, #tpu.memory_space<vmem>>, vector<1x16xf32>
    %c5_91 = arith.constant 5 : index
    %c16_92 = arith.constant 16 : index
    %109 = vector.load %arg27[%c5_91, %c16_92] : memref<8x32xf32, #tpu.memory_space<vmem>>, vector<1x16xf32>
    %c32_i32 = arith.constant 32 : i32
    %110 = vector.broadcast %c32_i32 : i32 to vector<1x16xi32>
    %111 = arith.addi %0, %110 : vector<1x16xi32>
    %c1_i32_93 = arith.constant 1 : i32
    %112 = vector.broadcast %c1_i32_93 : i32 to vector<1x16xi32>
    %113 = arith.addi %111, %112 : vector<1x16xi32>
    %c40_i32 = arith.constant 40 : i32
    %114 = vector.broadcast %c40_i32 : i32 to vector<1x16xi32>
    %115 = arith.addi %0, %114 : vector<1x16xi32>
    %c1_i32_94 = arith.constant 1 : i32
    %116 = vector.broadcast %c1_i32_94 : i32 to vector<1x16xi32>
    %117 = arith.addi %115, %116 : vector<1x16xi32>
    %118 = arith.cmpf ogt, %107, %106 : vector<1x16xf32>
    %119 = arith.select %118, %113, %111 : vector<1x16xi1>, vector<1x16xi32>
    %120 = arith.select %118, %107, %106 : vector<1x16xi1>, vector<1x16xf32>
    %121 = arith.cmpf ogt, %108, %120 : vector<1x16xf32>
    %122 = arith.select %121, %115, %119 : vector<1x16xi1>, vector<1x16xi32>
    %123 = arith.select %121, %108, %120 : vector<1x16xi1>, vector<1x16xf32>
    %124 = arith.cmpf ogt, %109, %123 : vector<1x16xf32>
    %125 = arith.select %124, %117, %122 : vector<1x16xi1>, vector<1x16xi32>
    %126 = arith.select %124, %109, %123 : vector<1x16xi1>, vector<1x16xf32>
    %c6 = arith.constant 6 : index
    %c0_95 = arith.constant 0 : index
    %127 = vector.load %arg27[%c6, %c0_95] : memref<8x32xf32, #tpu.memory_space<vmem>>, vector<1x16xf32>
    %c6_96 = arith.constant 6 : index
    %c16_97 = arith.constant 16 : index
    %128 = vector.load %arg27[%c6_96, %c16_97] : memref<8x32xf32, #tpu.memory_space<vmem>>, vector<1x16xf32>
    %c7 = arith.constant 7 : index
    %c0_98 = arith.constant 0 : index
    %129 = vector.load %arg27[%c7, %c0_98] : memref<8x32xf32, #tpu.memory_space<vmem>>, vector<1x16xf32>
    %c7_99 = arith.constant 7 : index
    %c16_100 = arith.constant 16 : index
    %130 = vector.load %arg27[%c7_99, %c16_100] : memref<8x32xf32, #tpu.memory_space<vmem>>, vector<1x16xf32>
    %c48_i32 = arith.constant 48 : i32
    %131 = vector.broadcast %c48_i32 : i32 to vector<1x16xi32>
    %132 = arith.addi %0, %131 : vector<1x16xi32>
    %c1_i32_101 = arith.constant 1 : i32
    %133 = vector.broadcast %c1_i32_101 : i32 to vector<1x16xi32>
    %134 = arith.addi %132, %133 : vector<1x16xi32>
    %c56_i32 = arith.constant 56 : i32
    %135 = vector.broadcast %c56_i32 : i32 to vector<1x16xi32>
    %136 = arith.addi %0, %135 : vector<1x16xi32>
    %c1_i32_102 = arith.constant 1 : i32
    %137 = vector.broadcast %c1_i32_102 : i32 to vector<1x16xi32>
    %138 = arith.addi %136, %137 : vector<1x16xi32>
    %139 = arith.cmpf ogt, %128, %127 : vector<1x16xf32>
    %140 = arith.select %139, %134, %132 : vector<1x16xi1>, vector<1x16xi32>
    %141 = arith.select %139, %128, %127 : vector<1x16xi1>, vector<1x16xf32>
    %142 = arith.cmpf ogt, %129, %141 : vector<1x16xf32>
    %143 = arith.select %142, %136, %140 : vector<1x16xi1>, vector<1x16xi32>
    %144 = arith.select %142, %129, %141 : vector<1x16xi1>, vector<1x16xf32>
    %145 = arith.cmpf ogt, %130, %144 : vector<1x16xf32>
    %146 = arith.select %145, %138, %143 : vector<1x16xi1>, vector<1x16xi32>
    %147 = arith.select %145, %130, %144 : vector<1x16xi1>, vector<1x16xf32>
    %148 = tpu.concatenate %84, %105, %126, %147 in 1 : vector<1x16xf32>, vector<1x16xf32>, vector<1x16xf32>, vector<1x16xf32> -> vector<1x64xf32>
    %149 = tpu.concatenate %83, %104, %125, %146 in 1 : vector<1x16xi32>, vector<1x16xi32>, vector<1x16xi32>, vector<1x16xi32> -> vector<1x64xi32>
    %c0_103 = arith.constant 0 : index
    %c0_104 = arith.constant 0 : index
    %150 = vector.load %arg2[%c0_103, %c0_104] : memref<1x48xf32, #tpu.memory_space<vmem>>, vector<1x48xf32>
    %c1_105 = arith.constant 1 : index
    %c0_106 = arith.constant 0 : index
    %c0_107 = arith.constant 0 : index
    %151 = vector.load %arg0[%c1_105, %c0_106, %c0_107] : memref<2x14x14xf32, #tpu.memory_space<vmem>>, vector<1x12x14xf32>
    %152 = vector.shape_cast %151 : vector<1x12x14xf32> to vector<12x14xf32>
    %c0_108 = arith.constant 0 : index
    %c0_109 = arith.constant 0 : index
    %c0_110 = arith.constant 0 : index
    %153 = vector.load %arg1[%c0_108, %c0_109, %c0_110] : memref<3x14x48xf32, #tpu.memory_space<vmem>>, vector<1x14x48xf32>
    %154 = vector.shape_cast %153 : vector<1x14x48xf32> to vector<14x48xf32>
    %cst_111 = arith.constant dense<0.000000e+00> : vector<12x48xf32>
    %155 = tpu.matmul %152, %154, %cst_111 {dimension_numbers = #tpu.dot_dimension_numbers<[1], [0], [0], [1], [0, 0, 1, 1], [], []>} : vector<12x14xf32>, vector<14x48xf32>, vector<12x48xf32> -> vector<12x48xf32>
    %156 = vector.broadcast %150 : vector<1x48xf32> to vector<12x48xf32>
    %157 = arith.addf %156, %155 : vector<12x48xf32>
    %c1_112 = arith.constant 1 : index
    %c1_113 = arith.constant 1 : index
    %c0_114 = arith.constant 0 : index
    %158 = vector.load %arg0[%c1_112, %c1_113, %c0_114] : memref<2x14x14xf32, #tpu.memory_space<vmem>>, vector<1x12x14xf32>
    %159 = vector.shape_cast %158 : vector<1x12x14xf32> to vector<12x14xf32>
    %c1_115 = arith.constant 1 : index
    %c0_116 = arith.constant 0 : index
    %c0_117 = arith.constant 0 : index
    %160 = vector.load %arg1[%c1_115, %c0_116, %c0_117] : memref<3x14x48xf32, #tpu.memory_space<vmem>>, vector<1x14x48xf32>
    %161 = vector.shape_cast %160 : vector<1x14x48xf32> to vector<14x48xf32>
    %cst_118 = arith.constant dense<0.000000e+00> : vector<12x48xf32>
    %162 = tpu.matmul %159, %161, %cst_118 {dimension_numbers = #tpu.dot_dimension_numbers<[1], [0], [0], [1], [0, 0, 1, 1], [], []>} : vector<12x14xf32>, vector<14x48xf32>, vector<12x48xf32> -> vector<12x48xf32>
    %163 = arith.addf %157, %162 : vector<12x48xf32>
    %c1_119 = arith.constant 1 : index
    %c2_120 = arith.constant 2 : index
    %c0_121 = arith.constant 0 : index
    %164 = vector.load %arg0[%c1_119, %c2_120, %c0_121] : memref<2x14x14xf32, #tpu.memory_space<vmem>>, vector<1x12x14xf32>
    %165 = vector.shape_cast %164 : vector<1x12x14xf32> to vector<12x14xf32>
    %c2_122 = arith.constant 2 : index
    %c0_123 = arith.constant 0 : index
    %c0_124 = arith.constant 0 : index
    %166 = vector.load %arg1[%c2_122, %c0_123, %c0_124] : memref<3x14x48xf32, #tpu.memory_space<vmem>>, vector<1x14x48xf32>
    %167 = vector.shape_cast %166 : vector<1x14x48xf32> to vector<14x48xf32>
    %cst_125 = arith.constant dense<0.000000e+00> : vector<12x48xf32>
    %168 = tpu.matmul %165, %167, %cst_125 {dimension_numbers = #tpu.dot_dimension_numbers<[1], [0], [0], [1], [0, 0, 1, 1], [], []>} : vector<12x14xf32>, vector<14x48xf32>, vector<12x48xf32> -> vector<12x48xf32>
    %169 = arith.addf %163, %168 : vector<12x48xf32>
    %cst_126 = arith.constant 0.000000e+00 : f32
    %170 = vector.broadcast %cst_126 : f32 to vector<12x48xf32>
    %171 = arith.maximumf %169, %170 : vector<12x48xf32>
    %c0_127 = arith.constant 0 : index
    %c0_128 = arith.constant 0 : index
    %172 = vector.load %arg25[%c0_127, %c0_128] : memref<12x48xf32, #tpu.memory_space<vmem>>, vector<12x48xf32>
    tpu.vector_store %arg25[%c0_127, %c0_128], %171 {strides = array<i32>} : memref<12x48xf32, #tpu.memory_space<vmem>>, vector<12x48xf32>,
    %c0_129 = arith.constant 0 : index
    %c0_130 = arith.constant 0 : index
    %173 = vector.load %arg4[%c0_129, %c0_130] : memref<1x80xf32, #tpu.memory_space<vmem>>, vector<1x80xf32>
    %c0_131 = arith.constant 0 : index
    %c0_132 = arith.constant 0 : index
    %174 = vector.load %arg25[%c0_131, %c0_132] : memref<12x48xf32, #tpu.memory_space<vmem>>, vector<10x48xf32>
    %c0_133 = arith.constant 0 : index
    %c0_134 = arith.constant 0 : index
    %c0_135 = arith.constant 0 : index
    %175 = vector.load %arg3[%c0_133, %c0_134, %c0_135] : memref<3x48x80xf32, #tpu.memory_space<vmem>>, vector<1x48x80xf32>
    %176 = vector.shape_cast %175 : vector<1x48x80xf32> to vector<48x80xf32>
    %cst_136 = arith.constant dense<0.000000e+00> : vector<10x80xf32>
    %177 = tpu.matmul %174, %176, %cst_136 {dimension_numbers = #tpu.dot_dimension_numbers<[1], [0], [0], [1], [0, 0, 1, 1], [], []>} : vector<10x48xf32>, vector<48x80xf32>, vector<10x80xf32> -> vector<10x80xf32>
    %178 = vector.broadcast %173 : vector<1x80xf32> to vector<10x80xf32>
    %179 = arith.addf %178, %177 : vector<10x80xf32>
    %c1_137 = arith.constant 1 : index
    %c0_138 = arith.constant 0 : index
    %180 = vector.load %arg25[%c1_137, %c0_138] : memref<12x48xf32, #tpu.memory_space<vmem>>, vector<10x48xf32>
    %c1_139 = arith.constant 1 : index
    %c0_140 = arith.constant 0 : index
    %c0_141 = arith.constant 0 : index
    %181 = vector.load %arg3[%c1_139, %c0_140, %c0_141] : memref<3x48x80xf32, #tpu.memory_space<vmem>>, vector<1x48x80xf32>
    %182 = vector.shape_cast %181 : vector<1x48x80xf32> to vector<48x80xf32>
    %cst_142 = arith.constant dense<0.000000e+00> : vector<10x80xf32>
    %183 = tpu.matmul %180, %182, %cst_142 {dimension_numbers = #tpu.dot_dimension_numbers<[1], [0], [0], [1], [0, 0, 1, 1], [], []>} : vector<10x48xf32>, vector<48x80xf32>, vector<10x80xf32> -> vector<10x80xf32>
    %184 = arith.addf %179, %183 : vector<10x80xf32>
    %c2_143 = arith.constant 2 : index
    %c0_144 = arith.constant 0 : index
    %185 = vector.load %arg25[%c2_143, %c0_144] : memref<12x48xf32, #tpu.memory_space<vmem>>, vector<10x48xf32>
    %c2_145 = arith.constant 2 : index
    %c0_146 = arith.constant 0 : index
    %c0_147 = arith.constant 0 : index
    %186 = vector.load %arg3[%c2_145, %c0_146, %c0_147] : memref<3x48x80xf32, #tpu.memory_space<vmem>>, vector<1x48x80xf32>
    %187 = vector.shape_cast %186 : vector<1x48x80xf32> to vector<48x80xf32>
    %cst_148 = arith.constant dense<0.000000e+00> : vector<10x80xf32>
    %188 = tpu.matmul %185, %187, %cst_148 {dimension_numbers = #tpu.dot_dimension_numbers<[1], [0], [0], [1], [0, 0, 1, 1], [], []>} : vector<10x48xf32>, vector<48x80xf32>, vector<10x80xf32> -> vector<10x80xf32>
    %189 = arith.addf %184, %188 : vector<10x80xf32>
    %cst_149 = arith.constant 0.000000e+00 : f32
    %190 = vector.broadcast %cst_149 : f32 to vector<10x80xf32>
    %191 = arith.maximumf %189, %190 : vector<10x80xf32>
    %c0_150 = arith.constant 0 : index
    %c0_151 = arith.constant 0 : index
    %192 = vector.load %arg26[%c0_150, %c0_151] : memref<10x80xf32, #tpu.memory_space<vmem>>, vector<10x80xf32>
    tpu.vector_store %arg26[%c0_150, %c0_151], %191 {strides = array<i32>} : memref<10x80xf32, #tpu.memory_space<vmem>>, vector<10x80xf32>,
    %c0_152 = arith.constant 0 : index
    %c0_153 = arith.constant 0 : index
    %193 = vector.load %arg6[%c0_152, %c0_153] : memref<1x32xf32, #tpu.memory_space<vmem>>, vector<1x32xf32>
    %c0_154 = arith.constant 0 : index
    %c0_155 = arith.constant 0 : index
    %194 = vector.load %arg26[%c0_154, %c0_155] : memref<10x80xf32, #tpu.memory_space<vmem>>, vector<8x80xf32>
    %c0_156 = arith.constant 0 : index
    %c0_157 = arith.constant 0 : index
    %c0_158 = arith.constant 0 : index
    %195 = vector.load %arg5[%c0_156, %c0_157, %c0_158] : memref<3x80x32xf32, #tpu.memory_space<vmem>>, vector<1x80x32xf32>
    %196 = vector.shape_cast %195 : vector<1x80x32xf32> to vector<80x32xf32>
    %cst_159 = arith.constant dense<0.000000e+00> : vector<8x32xf32>
    %197 = tpu.matmul %194, %196, %cst_159 {dimension_numbers = #tpu.dot_dimension_numbers<[1], [0], [0], [1], [0, 0, 1, 1], [], []>} : vector<8x80xf32>, vector<80x32xf32>, vector<8x32xf32> -> vector<8x32xf32>
    %198 = vector.broadcast %193 : vector<1x32xf32> to vector<8x32xf32>
    %199 = arith.addf %198, %197 : vector<8x32xf32>
    %c1_160 = arith.constant 1 : index
    %c0_161 = arith.constant 0 : index
    %200 = vector.load %arg26[%c1_160, %c0_161] : memref<10x80xf32, #tpu.memory_space<vmem>>, vector<8x80xf32>
    %c1_162 = arith.constant 1 : index
    %c0_163 = arith.constant 0 : index
    %c0_164 = arith.constant 0 : index
    %201 = vector.load %arg5[%c1_162, %c0_163, %c0_164] : memref<3x80x32xf32, #tpu.memory_space<vmem>>, vector<1x80x32xf32>
    %202 = vector.shape_cast %201 : vector<1x80x32xf32> to vector<80x32xf32>
    %cst_165 = arith.constant dense<0.000000e+00> : vector<8x32xf32>
    %203 = tpu.matmul %200, %202, %cst_165 {dimension_numbers = #tpu.dot_dimension_numbers<[1], [0], [0], [1], [0, 0, 1, 1], [], []>} : vector<8x80xf32>, vector<80x32xf32>, vector<8x32xf32> -> vector<8x32xf32>
    %204 = arith.addf %199, %203 : vector<8x32xf32>
    %c2_166 = arith.constant 2 : index
    %c0_167 = arith.constant 0 : index
    %205 = vector.load %arg26[%c2_166, %c0_167] : memref<10x80xf32, #tpu.memory_space<vmem>>, vector<8x80xf32>
    %c2_168 = arith.constant 2 : index
    %c0_169 = arith.constant 0 : index
    %c0_170 = arith.constant 0 : index
    %206 = vector.load %arg5[%c2_168, %c0_169, %c0_170] : memref<3x80x32xf32, #tpu.memory_space<vmem>>, vector<1x80x32xf32>
    %207 = vector.shape_cast %206 : vector<1x80x32xf32> to vector<80x32xf32>
    %cst_171 = arith.constant dense<0.000000e+00> : vector<8x32xf32>
    %208 = tpu.matmul %205, %207, %cst_171 {dimension_numbers = #tpu.dot_dimension_numbers<[1], [0], [0], [1], [0, 0, 1, 1], [], []>} : vector<8x80xf32>, vector<80x32xf32>, vector<8x32xf32> -> vector<8x32xf32>
    %209 = arith.addf %204, %208 : vector<8x32xf32>
    %cst_172 = arith.constant 0.000000e+00 : f32
    %210 = vector.broadcast %cst_172 : f32 to vector<8x32xf32>
    %211 = arith.maximumf %209, %210 : vector<8x32xf32>
    %c0_173 = arith.constant 0 : index
    %c0_174 = arith.constant 0 : index
    %212 = vector.load %arg27[%c0_173, %c0_174] : memref<8x32xf32, #tpu.memory_space<vmem>>, vector<8x32xf32>
    tpu.vector_store %arg27[%c0_173, %c0_174], %211 {strides = array<i32>} : memref<8x32xf32, #tpu.memory_space<vmem>>, vector<8x32xf32>,
    %c0_175 = arith.constant 0 : index
    %c0_176 = arith.constant 0 : index
    %213 = vector.load %arg27[%c0_175, %c0_176] : memref<8x32xf32, #tpu.memory_space<vmem>>, vector<1x16xf32>
    %c0_177 = arith.constant 0 : index
    %c16_178 = arith.constant 16 : index
    %214 = vector.load %arg27[%c0_177, %c16_178] : memref<8x32xf32, #tpu.memory_space<vmem>>, vector<1x16xf32>
    %c1_179 = arith.constant 1 : index
    %c0_180 = arith.constant 0 : index
    %215 = vector.load %arg27[%c1_179, %c0_180] : memref<8x32xf32, #tpu.memory_space<vmem>>, vector<1x16xf32>
    %c1_181 = arith.constant 1 : index
    %c16_182 = arith.constant 16 : index
    %216 = vector.load %arg27[%c1_181, %c16_182] : memref<8x32xf32, #tpu.memory_space<vmem>>, vector<1x16xf32>
    %c0_i32_183 = arith.constant 0 : i32
    %217 = vector.broadcast %c0_i32_183 : i32 to vector<1x16xi32>
    %218 = arith.addi %0, %217 : vector<1x16xi32>
    %c1_i32_184 = arith.constant 1 : i32
    %219 = vector.broadcast %c1_i32_184 : i32 to vector<1x16xi32>
    %220 = arith.addi %218, %219 : vector<1x16xi32>
    %c8_i32_185 = arith.constant 8 : i32
    %221 = vector.broadcast %c8_i32_185 : i32 to vector<1x16xi32>
    %222 = arith.addi %0, %221 : vector<1x16xi32>
    %c1_i32_186 = arith.constant 1 : i32
    %223 = vector.broadcast %c1_i32_186 : i32 to vector<1x16xi32>
    %224 = arith.addi %222, %223 : vector<1x16xi32>
    %225 = arith.cmpf ogt, %214, %213 : vector<1x16xf32>
    %226 = arith.select %225, %220, %218 : vector<1x16xi1>, vector<1x16xi32>
    %227 = arith.select %225, %214, %213 : vector<1x16xi1>, vector<1x16xf32>
    %228 = arith.cmpf ogt, %215, %227 : vector<1x16xf32>
    %229 = arith.select %228, %222, %226 : vector<1x16xi1>, vector<1x16xi32>
    %230 = arith.select %228, %215, %227 : vector<1x16xi1>, vector<1x16xf32>
    %231 = arith.cmpf ogt, %216, %230 : vector<1x16xf32>
    %232 = arith.select %231, %224, %229 : vector<1x16xi1>, vector<1x16xi32>
    %233 = arith.select %231, %216, %230 : vector<1x16xi1>, vector<1x16xf32>
    %c2_187 = arith.constant 2 : index
    %c0_188 = arith.constant 0 : index
    %234 = vector.load %arg27[%c2_187, %c0_188] : memref<8x32xf32, #tpu.memory_space<vmem>>, vector<1x16xf32>
    %c2_189 = arith.constant 2 : index
    %c16_190 = arith.constant 16 : index
    %235 = vector.load %arg27[%c2_189, %c16_190] : memref<8x32xf32, #tpu.memory_space<vmem>>, vector<1x16xf32>
    %c3_191 = arith.constant 3 : index
    %c0_192 = arith.constant 0 : index
    %236 = vector.load %arg27[%c3_191, %c0_192] : memref<8x32xf32, #tpu.memory_space<vmem>>, vector<1x16xf32>
    %c3_193 = arith.constant 3 : index
    %c16_194 = arith.constant 16 : index
    %237 = vector.load %arg27[%c3_193, %c16_194] : memref<8x32xf32, #tpu.memory_space<vmem>>, vector<1x16xf32>
    %c16_i32_195 = arith.constant 16 : i32
    %238 = vector.broadcast %c16_i32_195 : i32 to vector<1x16xi32>
    %239 = arith.addi %0, %238 : vector<1x16xi32>
    %c1_i32_196 = arith.constant 1 : i32
    %240 = vector.broadcast %c1_i32_196 : i32 to vector<1x16xi32>
    %241 = arith.addi %239, %240 : vector<1x16xi32>
    %c24_i32_197 = arith.constant 24 : i32
    %242 = vector.broadcast %c24_i32_197 : i32 to vector<1x16xi32>
    %243 = arith.addi %0, %242 : vector<1x16xi32>
    %c1_i32_198 = arith.constant 1 : i32
    %244 = vector.broadcast %c1_i32_198 : i32 to vector<1x16xi32>
    %245 = arith.addi %243, %244 : vector<1x16xi32>
    %246 = arith.cmpf ogt, %235, %234 : vector<1x16xf32>
    %247 = arith.select %246, %241, %239 : vector<1x16xi1>, vector<1x16xi32>
    %248 = arith.select %246, %235, %234 : vector<1x16xi1>, vector<1x16xf32>
    %249 = arith.cmpf ogt, %236, %248 : vector<1x16xf32>
    %250 = arith.select %249, %243, %247 : vector<1x16xi1>, vector<1x16xi32>
    %251 = arith.select %249, %236, %248 : vector<1x16xi1>, vector<1x16xf32>
    %252 = arith.cmpf ogt, %237, %251 : vector<1x16xf32>
    %253 = arith.select %252, %245, %250 : vector<1x16xi1>, vector<1x16xi32>
    %254 = arith.select %252, %237, %251 : vector<1x16xi1>, vector<1x16xf32>
    %c4_199 = arith.constant 4 : index
    %c0_200 = arith.constant 0 : index
    %255 = vector.load %arg27[%c4_199, %c0_200] : memref<8x32xf32, #tpu.memory_space<vmem>>, vector<1x16xf32>
    %c4_201 = arith.constant 4 : index
    %c16_202 = arith.constant 16 : index
    %256 = vector.load %arg27[%c4_201, %c16_202] : memref<8x32xf32, #tpu.memory_space<vmem>>, vector<1x16xf32>
    %c5_203 = arith.constant 5 : index
    %c0_204 = arith.constant 0 : index
    %257 = vector.load %arg27[%c5_203, %c0_204] : memref<8x32xf32, #tpu.memory_space<vmem>>, vector<1x16xf32>
    %c5_205 = arith.constant 5 : index
    %c16_206 = arith.constant 16 : index
    %258 = vector.load %arg27[%c5_205, %c16_206] : memref<8x32xf32, #tpu.memory_space<vmem>>, vector<1x16xf32>
    %c32_i32_207 = arith.constant 32 : i32
    %259 = vector.broadcast %c32_i32_207 : i32 to vector<1x16xi32>
    %260 = arith.addi %0, %259 : vector<1x16xi32>
    %c1_i32_208 = arith.constant 1 : i32
    %261 = vector.broadcast %c1_i32_208 : i32 to vector<1x16xi32>
    %262 = arith.addi %260, %261 : vector<1x16xi32>
    %c40_i32_209 = arith.constant 40 : i32
    %263 = vector.broadcast %c40_i32_209 : i32 to vector<1x16xi32>
    %264 = arith.addi %0, %263 : vector<1x16xi32>
    %c1_i32_210 = arith.constant 1 : i32
    %265 = vector.broadcast %c1_i32_210 : i32 to vector<1x16xi32>
    %266 = arith.addi %264, %265 : vector<1x16xi32>
    %267 = arith.cmpf ogt, %256, %255 : vector<1x16xf32>
    %268 = arith.select %267, %262, %260 : vector<1x16xi1>, vector<1x16xi32>
    %269 = arith.select %267, %256, %255 : vector<1x16xi1>, vector<1x16xf32>
    %270 = arith.cmpf ogt, %257, %269 : vector<1x16xf32>
    %271 = arith.select %270, %264, %268 : vector<1x16xi1>, vector<1x16xi32>
    %272 = arith.select %270, %257, %269 : vector<1x16xi1>, vector<1x16xf32>
    %273 = arith.cmpf ogt, %258, %272 : vector<1x16xf32>
    %274 = arith.select %273, %266, %271 : vector<1x16xi1>, vector<1x16xi32>
    %275 = arith.select %273, %258, %272 : vector<1x16xi1>, vector<1x16xf32>
    %c6_211 = arith.constant 6 : index
    %c0_212 = arith.constant 0 : index
    %276 = vector.load %arg27[%c6_211, %c0_212] : memref<8x32xf32, #tpu.memory_space<vmem>>, vector<1x16xf32>
    %c6_213 = arith.constant 6 : index
    %c16_214 = arith.constant 16 : index
    %277 = vector.load %arg27[%c6_213, %c16_214] : memref<8x32xf32, #tpu.memory_space<vmem>>, vector<1x16xf32>
    %c7_215 = arith.constant 7 : index
    %c0_216 = arith.constant 0 : index
    %278 = vector.load %arg27[%c7_215, %c0_216] : memref<8x32xf32, #tpu.memory_space<vmem>>, vector<1x16xf32>
    %c7_217 = arith.constant 7 : index
    %c16_218 = arith.constant 16 : index
    %279 = vector.load %arg27[%c7_217, %c16_218] : memref<8x32xf32, #tpu.memory_space<vmem>>, vector<1x16xf32>
    %c48_i32_219 = arith.constant 48 : i32
    %280 = vector.broadcast %c48_i32_219 : i32 to vector<1x16xi32>
    %281 = arith.addi %0, %280 : vector<1x16xi32>
    %c1_i32_220 = arith.constant 1 : i32
    %282 = vector.broadcast %c1_i32_220 : i32 to vector<1x16xi32>
    %283 = arith.addi %281, %282 : vector<1x16xi32>
    %c56_i32_221 = arith.constant 56 : i32
    %284 = vector.broadcast %c56_i32_221 : i32 to vector<1x16xi32>
    %285 = arith.addi %0, %284 : vector<1x16xi32>
    %c1_i32_222 = arith.constant 1 : i32
    %286 = vector.broadcast %c1_i32_222 : i32 to vector<1x16xi32>
    %287 = arith.addi %285, %286 : vector<1x16xi32>
    %288 = arith.cmpf ogt, %277, %276 : vector<1x16xf32>
    %289 = arith.select %288, %283, %281 : vector<1x16xi1>, vector<1x16xi32>
    %290 = arith.select %288, %277, %276 : vector<1x16xi1>, vector<1x16xf32>
    %291 = arith.cmpf ogt, %278, %290 : vector<1x16xf32>
    %292 = arith.select %291, %285, %289 : vector<1x16xi1>, vector<1x16xi32>
    %293 = arith.select %291, %278, %290 : vector<1x16xi1>, vector<1x16xf32>
    %294 = arith.cmpf ogt, %279, %293 : vector<1x16xf32>
    %295 = arith.select %294, %287, %292 : vector<1x16xi1>, vector<1x16xi32>
    %296 = arith.select %294, %279, %293 : vector<1x16xi1>, vector<1x16xf32>
    %297 = tpu.concatenate %233, %254, %275, %296 in 1 : vector<1x16xf32>, vector<1x16xf32>, vector<1x16xf32>, vector<1x16xf32> -> vector<1x64xf32>
    %298 = tpu.concatenate %232, %253, %274, %295 in 1 : vector<1x16xi32>, vector<1x16xi32>, vector<1x16xi32>, vector<1x16xi32> -> vector<1x64xi32>
    %299 = tpu.concatenate %148, %297 in 0 : vector<1x64xf32>, vector<1x64xf32> -> vector<2x64xf32>
    %300 = tpu.concatenate %149, %298 in 0 : vector<1x64xi32>, vector<1x64xi32> -> vector<2x64xi32>
    %c0_223 = arith.constant 0 : index
    %c0_224 = arith.constant 0 : index
    %301 = vector.load %arg24[%c0_223, %c0_224] : memref<2x64xi32, #tpu.memory_space<vmem>>, vector<2x64xi32>
    tpu.vector_store %arg24[%c0_223, %c0_224], %300 {strides = array<i32>} : memref<2x64xi32, #tpu.memory_space<vmem>>, vector<2x64xi32>,
    %c0_225 = arith.constant 0 : index
    %c0_226 = arith.constant 0 : index
    %302 = vector.load %arg8[%c0_225, %c0_226] : memref<64x128xf32, #tpu.memory_space<vmem>>, vector<64x128xf32>
    %cst_227 = arith.constant dense<0.000000e+00> : vector<2x128xf32>
    %303 = tpu.matmul %299, %302, %cst_227 {dimension_numbers = #tpu.dot_dimension_numbers<[1], [0], [0], [1], [0, 0, 1, 1], [], []>} : vector<2x64xf32>, vector<64x128xf32>, vector<2x128xf32> -> vector<2x128xf32>
    %c0_228 = arith.constant 0 : index
    %c0_229 = arith.constant 0 : index
    %304 = vector.load %arg9[%c0_228, %c0_229] : memref<1x128xf32, #tpu.memory_space<vmem>>, vector<1x128xf32>
    %305 = vector.broadcast %304 : vector<1x128xf32> to vector<2x128xf32>
    %306 = arith.addf %303, %305 : vector<2x128xf32>
    %cst_230 = arith.constant 0.000000e+00 : f32
    %307 = vector.broadcast %cst_230 : f32 to vector<2x128xf32>
    %308 = arith.maximumf %306, %307 : vector<2x128xf32>
    %c0_231 = arith.constant 0 : index
    %c0_232 = arith.constant 0 : index
    %309 = vector.load %arg10[%c0_231, %c0_232] : memref<128x64xf32, #tpu.memory_space<vmem>>, vector<128x64xf32>
    %cst_233 = arith.constant dense<0.000000e+00> : vector<2x64xf32>
    %310 = tpu.matmul %308, %309, %cst_233 {dimension_numbers = #tpu.dot_dimension_numbers<[1], [0], [0], [1], [0, 0, 1, 1], [], []>} : vector<2x128xf32>, vector<128x64xf32>, vector<2x64xf32> -> vector<2x64xf32>
    %c0_234 = arith.constant 0 : index
    %c0_235 = arith.constant 0 : index
    %311 = vector.load %arg11[%c0_234, %c0_235] : memref<1x64xf32, #tpu.memory_space<vmem>>, vector<1x64xf32>
    %312 = vector.broadcast %311 : vector<1x64xf32> to vector<2x64xf32>
    %313 = arith.addf %310, %312 : vector<2x64xf32>
    %cst_236 = arith.constant 0.000000e+00 : f32
    %314 = vector.broadcast %cst_236 : f32 to vector<2x64xf32>
    %315 = arith.maximumf %313, %314 : vector<2x64xf32>
    %c0_237 = arith.constant 0 : index
    %c0_238 = arith.constant 0 : index
    %316 = vector.load %arg12[%c0_237, %c0_238] : memref<64x32xf32, #tpu.memory_space<vmem>>, vector<64x32xf32>
    %cst_239 = arith.constant dense<0.000000e+00> : vector<2x32xf32>
    %317 = tpu.matmul %315, %316, %cst_239 {dimension_numbers = #tpu.dot_dimension_numbers<[1], [0], [0], [1], [0, 0, 1, 1], [], []>} : vector<2x64xf32>, vector<64x32xf32>, vector<2x32xf32> -> vector<2x32xf32>
    %c0_240 = arith.constant 0 : index
    %c0_241 = arith.constant 0 : index
    %318 = vector.load %arg13[%c0_240, %c0_241] : memref<1x32xf32, #tpu.memory_space<vmem>>, vector<1x32xf32>
    %319 = vector.broadcast %318 : vector<1x32xf32> to vector<2x32xf32>
    %320 = arith.addf %317, %319 : vector<2x32xf32>
    %cst_242 = arith.constant 0.000000e+00 : f32
    %321 = vector.broadcast %cst_242 : f32 to vector<2x32xf32>
    %322 = arith.maximumf %320, %321 : vector<2x32xf32>
    %c0_243 = arith.constant 0 : index
    %c0_244 = arith.constant 0 : index
    %323 = vector.load %arg14[%c0_243, %c0_244] : memref<32x16xf32, #tpu.memory_space<vmem>>, vector<32x16xf32>
    %cst_245 = arith.constant dense<0.000000e+00> : vector<2x16xf32>
    %324 = tpu.matmul %322, %323, %cst_245 {dimension_numbers = #tpu.dot_dimension_numbers<[1], [0], [0], [1], [0, 0, 1, 1], [], []>} : vector<2x32xf32>, vector<32x16xf32>, vector<2x16xf32> -> vector<2x16xf32>
    %c0_246 = arith.constant 0 : index
    %c0_247 = arith.constant 0 : index
    %325 = vector.load %arg15[%c0_246, %c0_247] : memref<1x16xf32, #tpu.memory_space<vmem>>, vector<1x16xf32>
    %326 = vector.broadcast %325 : vector<1x16xf32> to vector<2x16xf32>
    %327 = arith.addf %324, %326 : vector<2x16xf32>
    %cst_248 = arith.constant 0.000000e+00 : f32
    %328 = vector.broadcast %cst_248 : f32 to vector<2x16xf32>
    %329 = arith.maximumf %327, %328 : vector<2x16xf32>
    %c0_249 = arith.constant 0 : index
    %c0_250 = arith.constant 0 : index
    %330 = vector.load %arg16[%c0_249, %c0_250] : memref<16x8xf32, #tpu.memory_space<vmem>>, vector<16x8xf32>
    %cst_251 = arith.constant dense<0.000000e+00> : vector<2x8xf32>
    %331 = tpu.matmul %329, %330, %cst_251 {dimension_numbers = #tpu.dot_dimension_numbers<[1], [0], [0], [1], [0, 0, 1, 1], [], []>} : vector<2x16xf32>, vector<16x8xf32>, vector<2x8xf32> -> vector<2x8xf32>
    %c0_252 = arith.constant 0 : index
    %c0_253 = arith.constant 0 : index
    %332 = vector.load %arg17[%c0_252, %c0_253] : memref<1x8xf32, #tpu.memory_space<vmem>>, vector<1x8xf32>
    %333 = vector.broadcast %332 : vector<1x8xf32> to vector<2x8xf32>
    %334 = arith.addf %331, %333 : vector<2x8xf32>
    %c0_254 = arith.constant 0 : index
    %c0_255 = arith.constant 0 : index
    %335 = vector.load %arg18[%c0_254, %c0_255] : memref<16x8xf32, #tpu.memory_space<vmem>>, vector<16x8xf32>
    %cst_256 = arith.constant dense<0.000000e+00> : vector<2x8xf32>
    %336 = tpu.matmul %329, %335, %cst_256 {dimension_numbers = #tpu.dot_dimension_numbers<[1], [0], [0], [1], [0, 0, 1, 1], [], []>} : vector<2x16xf32>, vector<16x8xf32>, vector<2x8xf32> -> vector<2x8xf32>
    %c0_257 = arith.constant 0 : index
    %c0_258 = arith.constant 0 : index
    %337 = vector.load %arg19[%c0_257, %c0_258] : memref<1x8xf32, #tpu.memory_space<vmem>>, vector<1x8xf32>
    %338 = vector.broadcast %337 : vector<1x8xf32> to vector<2x8xf32>
    %339 = arith.addf %336, %338 : vector<2x8xf32>
    %340 = math.exp %339 : vector<2x8xf32>
    %c0_259 = arith.constant 0 : index
    %c0_260 = arith.constant 0 : index
    %341 = memref.load %arg20[%c0_259, %c0_260] : memref<1x1xf32, #tpu.memory_space<smem>>
    %342 = vector.broadcast %341 : f32 to vector<2x8xf32>
    %343 = arith.mulf %340, %342 : vector<2x8xf32>
    %344 = arith.addf %334, %343 : vector<2x8xf32>
    %c0_261 = arith.constant 0 : index
    %c0_262 = arith.constant 0 : index
    %345 = vector.load %arg21[%c0_261, %c0_262] : memref<2x8xf32, #tpu.memory_space<vmem>>, vector<2x8xf32>
    tpu.vector_store %arg21[%c0_261, %c0_262], %344 {strides = array<i32>} : memref<2x8xf32, #tpu.memory_space<vmem>>, vector<2x8xf32>,
    %c0_263 = arith.constant 0 : index
    %c0_264 = arith.constant 0 : index
    %346 = vector.load %arg22[%c0_263, %c0_264] : memref<2x8xf32, #tpu.memory_space<vmem>>, vector<2x8xf32>
    tpu.vector_store %arg22[%c0_263, %c0_264], %334 {strides = array<i32>} : memref<2x8xf32, #tpu.memory_space<vmem>>, vector<2x8xf32>,
    %c0_265 = arith.constant 0 : index
    %c0_266 = arith.constant 0 : index
    %347 = vector.load %arg23[%c0_265, %c0_266] : memref<2x8xf32, #tpu.memory_space<vmem>>, vector<2x8xf32>
    tpu.vector_store %arg23[%c0_265, %c0_266], %340 {strides = array<i32>} : memref<2x8xf32, #tpu.memory_space<vmem>>, vector<2x8xf32>,
    return
  }
}

</mosaic_0001>

<bundles_post_ra>
// kernel: _lambda_.1
= control target key start
LH: loop header
LB: loop body
LE: loop exit
PB: predicated region body
PF: predicated region fallthrough
CT: control target
= control target key end

     0   :  { %s3117_s0 = inlined_call_operand.vmem [shape: f32[2,14,14], index: 0, kind: input, shape index: {}]   ;;  %s3118_s1 = inlined_call_operand.hbm [shape: f32[3,14,48], index: 1, kind: input, shape index: {}]   ;;  %s3119_s2 = inlined_call_operand.hbm [shape: f32[1,48], index: 2, kind: input, shape index: {}]   ;;  %s3120_s3 = inlined_call_operand.hbm [shape: f32[3,48,80], index: 3, kind: input, shape index: {}]   ;;  %s3121_s4 = inlined_call_operand.hbm [shape: f32[1,80], index: 4, kind: input, shape index: {}]   ;;  %s3122_s5 = inlined_call_operand.hbm [shape: f32[3,80,32], index: 5, kind: input, shape index: {}]   ;;  %s3123_s6 = inlined_call_operand.hbm [shape: f32[1,32], index: 6, kind: input, shape index: {}]   ;;  %s3124_s7 = inlined_call_operand.hbm [shape: s32[1,16], index: 7, kind: input, shape index: {}]   ;;  %s3125_s8 = inlined_call_operand.hbm [shape: f32[64,128], index: 8, kind: input, shape index: {}]   ;;  %s3126_s9 = inlined_call_operand.hbm [shape: f32[1,128], index: 9, kind: input, shape index: {}]   ;;  %s3127_s10 = inlined_call_operand.vmem [shape: f32[128,64], index: 10, kind: input, shape index: {}]   ;;  %s3128_s11 = inlined_call_operand.hbm [shape: f32[1,64], index: 11, kind: input, shape index: {}]   ;;  %s3129_s12 = inlined_call_operand.hbm [shape: f32[64,32], index: 12, kind: input, shape index: {}]   ;;  %s3130_s13 = inlined_call_operand.vmem [shape: f32[1,32], index: 13, kind: input, shape index: {}]   ;;  %s3131_s14 = inlined_call_operand.hbm [shape: f32[32,16], index: 14, kind: input, shape index: {}]   ;;  %s3132_s15 = inlined_call_operand.vmem [shape: f32[1,16], index: 15, kind: input, shape index: {}]   ;;  %s3133_s16 = inlined_call_operand.hbm [shape: f32[16,8], index: 16, kind: input, shape index: {}]   ;;  %s3134_s17 = inlined_call_operand.vmem [shape: f32[1,8], index: 17, kind: input, shape index: {}]   ;;  %s3135_s18 = inlined_call_operand.hbm [shape: f32[16,8], index: 18, kind: input, shape index: {}]   ;;  %s3136_s19 = inlined_call_operand.vmem [shape: f32[1,8], index: 19, kind: input, shape index: {}]   ;;  %s3137_s20 = inlined_call_operand.<no memory space> [shape: f32[1,1], index: 20, kind: input, shape index: {}]   ;;  %s3138_s21 = inlined_call_operand.hbm [shape: f32[2,8], index: 21, kind: output, shape index: {0}]   ;;  %s3139_s22 = inlined_call_operand.hbm [shape: f32[2,8], index: 22, kind: output, shape index: {1}]   ;;  %s3140_s23 = inlined_call_operand.hbm [shape: f32[2,8], index: 23, kind: output, shape index: {2}]   ;;  %s3141_s24 = inlined_call_operand.vmem [shape: s32[2,64], index: 24, kind: output, shape index: {3}]  }
   0x1   :  { %3156 = sst [smem:[#allocation43_spill]] %s3117_s0 }
   0x2   :  { %3157 = sst [smem:[#allocation44_spill]] %s3118_s1 }
   0x3   :  { %3158 = sst [smem:[#allocation45_spill]] %s3119_s2 }
   0x4   :  { %3159 = sst [smem:[#allocation46_spill]] %s3120_s3 }
   0x5   :  { %3160 = sst [smem:[#allocation47_spill]] %s3121_s4 }
   0x6   :  { %3161 = sst [smem:[#allocation48_spill]] %s3122_s5 }
   0x7   :  { %3162 = sst [smem:[#allocation49_spill]] %s3123_s6 }
   0x8   :  { %3163 = sst [smem:[#allocation50_spill]] %s3124_s7 }
   0x9   :  { %3164 = sst [smem:[#allocation51_spill]] %s3125_s8 }
   0xa   :  { %3165 = sst [smem:[#allocation52_spill]] %s3137_s20 }
   0xb   :  { %3166 = sst [smem:[#allocation53_spill]] %s3138_s21 }
   0xc   :  { %3167 = sst [smem:[#allocation54_spill]] %s3140_s23 }
   0xd   :  { %31 = vsyncpa [#allocation7], 0 }
   0xe   :  { %32 = vsyncpa [#allocation10], 0 }
   0xf   :  { %33 = vsyncpa [#allocation13], 0 }
  0x10   :  { %34 = vsyncpa [#allocation16], 0 }
  0x11   :  { %35 = vsyncpa [#allocation19], 0 }
  0x12   :  { %36 = vsyncpa [#allocation22], 0 }
  0x13   :  { %37 = vsyncpa [#allocation25], 0 }
  0x14   :  { %38 = vsyncpa [#allocation28], 0 }
  0x15   :  { %39 = vsyncpa [#allocation8], 0  ;;  %s3168_s27 = sld [smem:[#allocation45_spill]] }
  0x1b   :  { %s61_s28 = sshll.u32 %s3168_s27, 4  ;;  %s62_s28 = int_to_ptr.hbm [resolvable:$true] %s61_s28 }
  0x1c   :  { %40 = vsyncpa [#allocation31], 0  ;;  %s2119_s6 = smov [#allocation9]   ;;  %s3169_s7 = sld [smem:[#allocation47_spill]] }
  0x1d   :  { %s63_s2 = sshll.u32 %s2119_s6, 4  ;;  %s2120_s3 = smov [#allocation12]   ;;  %s64_s2 = int_to_ptr.vmem [resolvable:$true] %s63_s2 }
  0x1e   :  { %66 = dma.hbm_to_vmem [thread:$0]  %s62_s28, 16, %s64_s2, [#allocation10]  }
  0x1f   :  { %s87_s25 = sshll.u32 %s2120_s3, 4  ;;  %s3170_s1 = sld [smem:[#allocation49_spill]]  ;;  %s88_s25 = int_to_ptr.vmem [resolvable:$true] %s87_s25 }
  0x20   :  { %s2121_s5 = smov [#allocation15]   ;;  %s3171_s20 = sld [smem:[#allocation51_spill]] }
  0x21   :  { %s111_s26 = sshll.u32 %s2121_s5, 4  ;;  %s2122_s28 = smov [#allocation18]   ;;  %s112_s26 = int_to_ptr.vmem [resolvable:$true] %s111_s26 }
  0x22   :  { %s85_s30 = sshll.u32 %s3169_s7, 4  ;;  %s132_s2 = sshll.u32 %s2122_s28, 4  ;;  %s86_s30 = int_to_ptr.hbm [resolvable:$true] %s85_s30  ;;  %s133_s2 = int_to_ptr.vmem [resolvable:$true] %s132_s2 }
  0x23   :  { %90 = dma.hbm_to_vmem [thread:$0]  %s86_s30, 16, %s88_s25, [#allocation13]  }
  0x24   :  { %s157_s7 = sshll.u32 %s3128_s11, 4  ;;  %s2123_s3 = smov 128   ;;  %s158_s7 = int_to_ptr.hbm [resolvable:$true] %s157_s7 }
  0x25   :  { %s109_s21 = sshll.u32 %s3170_s1, 4  ;;  %s2124_s8 = smov 8   ;;  %s110_s21 = int_to_ptr.hbm [resolvable:$true] %s109_s21 }
  0x26   :  { %s130_s23 = sshll.u32 %s3171_s20, 4  ;;  %s182_s20 = sshll.u32 %s3131_s14, 4  ;;  %s131_s23 = int_to_ptr.hbm [resolvable:$true] %s130_s23  ;;  %s183_s20 = int_to_ptr.hbm [resolvable:$true] %s182_s20 }
  0x27   :  { %114 = dma.hbm_to_vmem [thread:$0]  %s110_s21, 16, %s112_s26, [#allocation16]  }
  0x28   :  { %138 = dma.hbm_to_vmem [thread:$0]  %s131_s23, 1024, %s133_s2, [#allocation19], %s2123_s3, %s2123_s3, %s2124_s8  }
  0x29   :  { %s2125_s21 = smov [#allocation21]   ;;  %s2126_s1 = smov [#allocation24]  }
  0x2a   :  { %s159_s4 = sshll.u32 %s2125_s21, 4  ;;  %s184_s5 = sshll.u32 %s2126_s1, 4  ;;  %s160_s4 = int_to_ptr.vmem [resolvable:$true] %s159_s4  ;;  %s185_s5 = int_to_ptr.vmem [resolvable:$true] %s184_s5 }
  0x2b   :  { %162 = dma.hbm_to_vmem [thread:$0]  %s158_s7, 16, %s160_s4, [#allocation22]  }
  0x2c   :  { %s3172_s27 = sld [smem:[#allocation44_spill]]  ;;  %s2127_s29 = smov [#allocation6]  }
  0x2d   :  { %190 = dma.hbm_to_vmem [thread:$0]  %s183_s20, 512, %s185_s5, [#allocation25], %s2123_s3, %s2123_s3, %s2124_s8  }
  0x2e   :  { %s3173_s14 = sld [smem:[#allocation46_spill]]  ;;  %s49_s0 = sshll.u32 %s2127_s29, 4  ;;  %s50_s0 = int_to_ptr.vmem [resolvable:$true] %s49_s0 }
  0x2f   :  { %s2128_s7 = smov [#allocation11]   ;;  %s3174_s4 = sld [smem:[#allocation48_spill]] }
  0x30   :  { %s73_s30 = sshll.u32 %s2128_s7, 4  ;;  %s3175_s11 = sld [smem:[#allocation50_spill]]  ;;  %s74_s30 = int_to_ptr.vmem [resolvable:$true] %s73_s30 }
  0x31   :  { %s2131_s25 = smov [#allocation20]  }
  0x32   :  { %s47_s6 = sshll.u32 %s3172_s27, 4  ;;  %s2129_s27 = smov [#allocation14]   ;;  %s48_s6 = int_to_ptr.hbm [resolvable:$true] %s47_s6 }
  0x33   :  { %55 = dma.hbm_to_vmem [thread:$0]  %s48_s6, 768, %s50_s0, [#allocation7], %s2123_s3, %s2123_s3, %s2124_s8  }
  0x34   :  { %s71_s2 = sshll.u32 %s3173_s14, 4  ;;  %s97_s23 = sshll.u32 %s2129_s27, 4  ;;  %s72_s2 = int_to_ptr.hbm [resolvable:$true] %s71_s2  ;;  %s98_s23 = int_to_ptr.vmem [resolvable:$true] %s97_s23 }
  0x35   :  { %s95_s1 = sshll.u32 %s3174_s4, 4  ;;  %s2130_s6 = smov [#allocation17]   ;;  %s96_s1 = int_to_ptr.hbm [resolvable:$true] %s95_s1 }
  0x36   :  { %79 = dma.hbm_to_vmem [thread:$0]  %s72_s2, 2304, %s74_s30, [#allocation10], %s2123_s3, %s2123_s3, %s2124_s8  }
  0x37   :  { %s120_s26 = sshll.u32 %s3175_s11, 4  ;;  %s122_s28 = sshll.u32 %s2130_s6, 4  ;;  %s121_s26 = int_to_ptr.hbm [resolvable:$true] %s120_s26  ;;  %s123_s28 = int_to_ptr.vmem [resolvable:$true] %s122_s28 }
  0x38   :  { %103 = dma.hbm_to_vmem [thread:$0]  %s96_s1, 3840, %s98_s23, [#allocation13], %s2123_s3, %s2123_s3, %s2124_s8  }
  0x39   :  { %s144_s0 = sshll.u32 %s3126_s9, 4  ;;  %s167_s30 = sshll.u32 %s3129_s12, 4  ;;  %s145_s0 = int_to_ptr.hbm [resolvable:$true] %s144_s0  ;;  %s168_s30 = int_to_ptr.hbm [resolvable:$true] %s167_s30 }
  0x3a   :  { %125 = dma.hbm_to_vmem [thread:$0]  %s121_s26, 16, %s123_s28, [#allocation16]  }
  0x3b   :  { %s146_s21 = sshll.u32 %s2131_s25, 4  ;;  %s2132_s4 = smov [#allocation23]   ;;  %s147_s21 = int_to_ptr.vmem [resolvable:$true] %s146_s21 }
  0x3c   :  { %149 = dma.hbm_to_vmem [thread:$0]  %s145_s0, 16, %s147_s21, [#allocation19]  }
  0x3d   :  { %s169_s1 = sshll.u32 %s2132_s4, 4  ;;  %s197_s11 = sshll.u32 %s3133_s16, 4  ;;  %s170_s1 = int_to_ptr.vmem [resolvable:$true] %s169_s1  ;;  %s198_s11 = int_to_ptr.hbm [resolvable:$true] %s197_s11 }
  0x3e   :  { %175 = dma.hbm_to_vmem [thread:$0]  %s168_s30, 1024, %s170_s1, [#allocation22], %s2123_s3, %s2123_s3, %s2124_s8  }
  0x3f   :  { %s212_s12 = sshll.u32 %s3135_s18, 4  ;;  %s2133_s27 = smov [#allocation26]   ;;  %s213_s12 = int_to_ptr.hbm [resolvable:$true] %s212_s12 }
  0x40   :  { %s199_s23 = sshll.u32 %s2133_s27, 4  ;;  %s2134_s6 = smov [#allocation27]   ;;  %s200_s23 = int_to_ptr.vmem [resolvable:$true] %s199_s23 }
  0x41   :  { %205 = dma.hbm_to_vmem [thread:$0]  %s198_s11, 256, %s200_s23, [#allocation25], %s2123_s3, %s2123_s3, %s2124_s8  }
  0x42   :  { %s214_s16 = sshll.u32 %s2134_s6, 4  ;;  %s215_s16 = int_to_ptr.vmem [resolvable:$true] %s214_s16 }
  0x43   :  { %220 = dma.hbm_to_vmem [thread:$0]  %s213_s12, 256, %s215_s16, [#allocation28], %s2123_s3, %s2123_s3, %s2124_s8  }
  0x44   :  { %2099 = dma.done.wait [#allocation7], 768  }
  0x45   :  { %2100 = vsyncadd [#allocation7], 4294966528 }
  0x46   :  { %2101 = dma.done.wait [#allocation10], 2320  }
  0x47   :  { %2102 = vsyncadd [#allocation10], 4294964976 }
  0x48   :  { %2103 = dma.done.wait [#allocation13], 3856  }
  0x49   :  { %2104 = vsyncadd [#allocation13], 4294963440 }
  0x4a   :  { %2105 = dma.done.wait [#allocation16], 32  }
  0x4b   :  { %2106 = vsyncadd [#allocation16], 4294967264 }
  0x4c   :  { %2107 = dma.done.wait [#allocation19], 1040  }
  0x4d   :  { %2108 = vsyncadd [#allocation19], 4294966256 }
  0x4e   :  { %2109 = dma.done.wait [#allocation22], 1040  }
  0x4f   :  { %2110 = vsyncadd [#allocation22], 4294966256 }
  0x50   :  { %2111 = dma.done.wait [#allocation25], 768  }
  0x51   :  { %2112 = vsyncadd [#allocation25], 4294966528 }
  0x52   :  { %2113 = dma.done.wait [#allocation28], 256  }
  0x53   :  { %2114 = vsyncadd [#allocation28], 4294967040  ;;  %vm294_vm0 = vcmask 1045504   ;;  %v369_v0 = vld [vmem:[#allocation6 + $0x28] sm:$0x3f]  ;;  %v2332_v2 = vld [vmem:[#allocation6 + $0x20] sm:$0xff] }
  0x54   :  { %v286_v1 = vld [vmem:[#allocation6 + $0x8] sm:$0x3f]  ;;  %1613 = vmatpush.msk.msra.mxu2 %vm294_vm0, %v369_v0  ;;  %vm287_vm1 = vcmask 113664   ;;  %s3176_s8 = sld [smem:[#allocation43_spill]]  ;;  %v2339_v4 = vld [vmem:[#allocation6] sm:$0xff]  ;;  %v2345_v7 = vld [vmem:[#allocation6 + $0x10] sm:$0xff] }
  0x55   :  { %1607 = vmatpush.msk.msra.mxu0 %vm294_vm0, %v286_v1  ;;  %v330_v5 = vld [vmem:[#allocation6 + $0x18] sm:$0x3f]  ;;  %v2374_v14 = vld [vmem:[#allocation11 + $0x58] sm:$0xff]  ;;  %v2383_v17 = vld [vmem:[#allocation11 + $0x10] sm:$0xff]  ;;  %vm406_vm2 = vcmask 392192   ;;  %vm408_vm3 = vcmask 388096  }
  0x56   :  { %1610 = vmatpush.msk.msra.mxu1 %vm294_vm0, %v330_v5  ;;  %394 = vmatpush.msra.mxu2 %v2332_v2  ;;  %v2368_v12 = vld [vmem:[#allocation11 + $0x28] sm:$0xff]  ;;  %v2371_v13 = vld [vmem:[#allocation11 + $0x20] sm:$0xff]  ;;  %v2376_v15 = vld [vmem:[#allocation11 + $0x18] sm:$0xff]  ;;  %vm535_vm4 = vcmask 654336   ;;  %vm537_vm5 = vcmask 648192   ;;  %vm651_vm6 = vcmask 261120  }
  0x57   :  { %313 = vmatpush.msra.mxu0 %v2339_v4  ;;  %435 = vmatpush.msra.mxu3 %v2368_v12  ;;  %v2378_v16 = vld [vmem:[#allocation11 + $0x88] sm:$0xff]  ;;  %v2389_v19 = vld [vmem:[#allocation11 + $0x50] sm:$0xff]  ;;  %v2391_v20 = vld [vmem:[#allocation11 + $0x80] sm:$0xff]  ;;  %s2135_s3 = smov 16   ;;  %s2137_s28 = smov 32  }
  0x58   :  { %355 = vmatpush.msra.mxu1 %v2345_v7  ;;  %v2386_v18 = vld [vmem:[#allocation11 + $0x8] sm:$0xff]  ;;  %v2393_v21 = vld [vmem:[#allocation11] sm:$0xff]  ;;  %v2402_v24 = vld [vmem:[#allocation11 + $0x78] sm:$0xff]  ;;  %s2138_s9 = smov [#allocation30]   ;;  %s1566_s23 = sshll.u32 %s3139_s22, 4  ;;  %s1567_s23 = int_to_ptr.hbm [resolvable:$true] %s1566_s23 }
  0x59   :  { %436 = vmatpush.msra.mxu3 %v2371_v13  ;;  %478 = vmatpush.msrb.mxu0 %v2374_v14  ;;  %v2397_v22 = vld [vmem:[#allocation11 + $0x48] sm:$0xff]  ;;  %v2400_v23 = vld [vmem:[#allocation11 + $0x40] sm:$0xff]  ;;  %v2406_v25 = vld [vmem:[#allocation11 + $0x70] sm:$0xff]  ;;  %s1564_s26 = sshll.u32 %s2138_s9, 4  ;;  %s3190_s14 = sld [smem:[#allocation54_spill]]  ;;  %s1565_s26 = int_to_ptr.vmem [resolvable:$true] %s1564_s26 }
  0x5a   :  { %v365_v3 = vld [vmem:[%s3176_s8 + $0x2] sm:$0xff]  ;;  %v366_v9 = vld [vmem:[%s3176_s8 + $0xa] sm:$0xf]  ;;  %518 = vmatpush.msrb.mxu1 %v2378_v16  ;;  %v2408_v26 = vld [vmem:[#allocation11 + $0x38] sm:$0xff]  ;;  %s3191_s7 = sld [smem:[#allocation52_spill]] }
  0x5b   :  { %v283_v6 = vld [vmem:[%s3176_s8] sm:$0xff]  ;;  %1614 = vmatmul.msk.f32.vlgmr.msra.gmra.mxu2 %vm287_vm1, %v365_v3  ;;  %v284_v10 = vld [vmem:[%s3176_s8 + $0x8] sm:$0xf]  ;;  %437 = vmatpush.msra.mxu3 %v2376_v15  ;;  %v1676_v30 = vld [vmem:[#allocation9] ss:$0 sm:$0xff]  ;;  %s3192_s4 = sld [smem:[#allocation53_spill]] }
  0x5c   :  { %v326_v8 = vld [vmem:[%s3176_s8 + $0x1] sm:$0xff]  ;;  %1608 = vmatmul.msk.f32.vlgmr.msra.gmra.mxu0 %vm287_vm1, %v283_v6  ;;  %v327_v11 = vld [vmem:[%s3176_s8 + $0x9] sm:$0xf]  ;;  %519 = vmatpush.msrb.mxu1 %v2391_v20  ;;  %v2422_v35 = vld [vmem:[#allocation14 + $0x48] sm:$0xff] }
  0x5d   :  { %1611 = vmatmul.msk.f32.vlgmr.msra.gmra.mxu1 %vm287_vm1, %v326_v8  ;;  %438 = vmatpush.msra.mxu3 %v2383_v17  ;;  %v2410_v27 = vld [vmem:[#allocation11 + $0x68] sm:$0xff]  ;;  %v2414_v28 = vld [vmem:[#allocation11 + $0x30] sm:$0xff]  ;;  %v2416_v29 = vld [vmem:[#allocation11 + $0x60] sm:$0xff] }
  0x5e   :  { %479 = vmatpush.msrb.mxu0 %v2389_v19  ;;  %520 = vmatpush.msrb.mxu1 %v2402_v24  ;;  %v2433_v52 = vld [vmem:[#allocation14 + $0x40] sm:$0xff]  ;;  %v2436_v53 = vld [vmem:[#allocation14 + $0x38] sm:$0xff]  ;;  %v2439_v54 = vld [vmem:[#allocation14 + $0x30] sm:$0xff] }
  0x5f   :  { %439 = vmatpush.msra.mxu3 %v2386_v18  ;;  %560 = vmatpush.msrb.mxu2 %v2422_v35  ;;  %v2442_v55 = vld [vmem:[#allocation14 + $0x28] sm:$0xff]  ;;  %v2444_v56 = vld [vmem:[#allocation14 + $0x98] sm:$0xff]  ;;  %v2451_v58 = vld [vmem:[#allocation14 + $0x20] sm:$0xff]  ;;  %s1577_s29 = sshll.u32 %s3190_s14, 4  ;;  %s1578_s29 = int_to_ptr.hbm [resolvable:$true] %s1577_s29 }
  0x60   :  { %480 = vmatpush.msrb.mxu0 %v2397_v22  ;;  %521 = vmatpush.msrb.mxu1 %v2406_v25  ;;  %v2446_v57 = vld [vmem:[#allocation14 + $0xe8] sm:$0xff]  ;;  %v2453_v59 = vld [vmem:[#allocation14 + $0x90] sm:$0xff]  ;;  %v2455_v60 = vld [vmem:[#allocation14 + $0xe0] sm:$0xff] }
  0x61   :  { %440 = vmatpush.msra.mxu3 %v2393_v21  ;;  %561 = vmatpush.msrb.mxu2 %v2433_v52  ;;  %v2460_v61 = vld [vmem:[#allocation14 + $0x18] sm:$0xff]  ;;  %v2462_v62 = vld [vmem:[#allocation14 + $0x88] sm:$0xff]  ;;  %v2469_v0 = vld [vmem:[#allocation14 + $0x10] sm:$0xff]  ;;  %s1555_s1 = sshll.u32 %s3192_s4, 4  ;;  %s1556_s1 = int_to_ptr.hbm [resolvable:$true] %s1555_s1 }
  0x62   :  { %481 = vmatpush.msrb.mxu0 %v2400_v23  ;;  %522 = vmatpush.msrb.mxu1 %v2410_v27  ;;  %v2464_v63 = vld [vmem:[#allocation14 + $0xd8] sm:$0xff]  ;;  %v2471_v1 = vld [vmem:[#allocation14 + $0x80] sm:$0xff]  ;;  %v2473_v3 = vld [vmem:[#allocation14 + $0xd0] sm:$0xff] }
  0x63   :  { %1615 = vmatmul.msk.f32.gmra.mxu2 %vm287_vm1, %v366_v9  ;;  %599 = vmatpush.msrb.mxu3 %v2444_v56  ;;  %v2478_v5 = vld [vmem:[#allocation14 + $0x8] sm:$0xff]  ;;  %v2480_v6 = vld [vmem:[#allocation14 + $0x78] sm:$0xff]  ;;  %v2487_v9 = vld [vmem:[#allocation14] sm:$0xff] }
  0x64   :  { %1609 = vmatmul.msk.f32.gmra.mxu0 %vm287_vm1, %v284_v10  ;;  %523 = vmatpush.msrb.mxu1 %v2416_v29  ;;  %v2482_v8 = vld [vmem:[#allocation14 + $0xc8] sm:$0xff]  ;;  %v2489_v10 = vld [vmem:[#allocation14 + $0x70] sm:$0xff] }
  0x65   :  { %1612 = vmatmul.msk.f32.gmra.mxu1 %vm287_vm1, %v327_v11  ;;  %482 = vmatpush.msrb.mxu0 %v2408_v26  ;;  %v2491_v11 = vld [vmem:[#allocation14 + $0xc0] sm:$0xff] }
  0x66   :  { %562 = vmatpush.msrb.mxu2 %v2436_v53  ;;  %600 = vmatpush.msrb.mxu3 %v2453_v59 }
  0x67   :  { %483 = vmatpush.msrb.mxu0 %v2414_v28 }
  0x68   :  { %563 = vmatpush.msrb.mxu2 %v2439_v54  ;;  %601 = vmatpush.msrb.mxu3 %v2462_v62 }
  0x69   :  { %635 = vmatpush.msra.mxu0 %v2446_v57 }
  0x6a   :  { %564 = vmatpush.msrb.mxu2 %v2442_v55  ;;  %602 = vmatpush.msrb.mxu3 %v2471_v1 }
  0x6b   :  { %636 = vmatpush.msra.mxu0 %v2455_v60 }
  0x6c   :  { %565 = vmatpush.msrb.mxu2 %v2451_v58  ;;  %603 = vmatpush.msrb.mxu3 %v2480_v6 }
  0x6d   :  { %637 = vmatpush.msra.mxu0 %v2464_v63 }
  0x6e   :  { %566 = vmatpush.msrb.mxu2 %v2460_v61  ;;  %604 = vmatpush.msrb.mxu3 %v2489_v10 }
  0x6f   :  { %638 = vmatpush.msra.mxu0 %v2473_v3 }
  0x70   :  { %567 = vmatpush.msrb.mxu2 %v2469_v0 }
  0x71   :  { %639 = vmatpush.msra.mxu0 %v2482_v8 }
  0x72   :  { %568 = vmatpush.msrb.mxu2 %v2478_v5 }
  0x73   :  { %640 = vmatpush.msra.mxu0 %v2491_v11 }
  0x74   :  { %569 = vmatpush.msrb.mxu2 %v2487_v9 }
  0xd9   :  { %v315_v31 = vpop.f32.mrf.mxu0 }
  0xda   :  { %v324_v32 = vadd.f32 %v1676_v30, %v315_v31  ;;  %v357_v33 = vpop.f32.mrf.mxu1  ;;  %v2497_v31 = vld [vmem:[#allocation14 + $0xb8] sm:$0xff] }
  0xdb   :  { %641 = vmatpush.msra.mxu0 %v2497_v31 }
  0xdc   :  { %v363_v34 = vadd.f32 %v357_v33, %v324_v32  ;;  %v2500_v32 = vld [vmem:[#allocation14 + $0x60] sm:$0xff] }
  0xdd   :  { %v842_v33 = vld [vmem:[#allocation6 + $0x8] sm:$0x3f] }
  0xde   :  { %v396_v36 = vpop.f32.mrf.mxu2  ;;  %1627 = vmatpush.msk.msra.mxu2 %vm294_vm0, %v842_v33  ;;  %v1680_v33 = vld [vmem:[#allocation12] ss:$0 sm:$0xff] }
  0xdf   :  { %v402_v37 = vadd.f32 %v396_v36, %v363_v34  ;;  %v883_v34 = vld [vmem:[#allocation6 + $0x18] sm:$0x3f] }
  0xe0   :  { %v2503_v36 = vld [vmem:[#allocation14 + $0xb0] sm:$0xff]  ;;  %1632 = vmatpush.msk.msra.mxu1 %vm294_vm0, %v883_v34  ;;  %867 = vmatpush.msra.mxu2 %v2339_v4  ;;  %v1677_v4 = vld [vmem:[#allocation12] ss:$0 sm:$0xff] }
  0xe1   :  { %v318_v38 = vpop.f32.mrf.mxu0  ;;  %v404_v39 = vmax.f32 %v402_v37, 0.0  ;;  %v2508_v37 = vld [vmem:[#allocation14 + $0x58] sm:$0xff]  ;;  %642 = vmatpush.msra.mxu0 %v2503_v36 }
  0xe2   :  { %v325_v40 = vadd.f32 %v1676_v30, %v318_v38  ;;  %v360_v41 = vpop.f32.mrf.mxu1  ;;  %v2495_v30 = vld [vmem:[#allocation14 + $0x68] sm:$0xff]  ;;  %908 = vmatpush.msra.mxu1 %v2345_v7 }
  0xe3   :  { %407 = vst.msk [vmem:[#allocation2] sm:$0xff] %vm406_vm2, %v404_v39  ;;  %605 = vmatpush.msrb.mxu3 %v2495_v30  ;;  %v2511_v38 = vld [vmem:[#allocation14 + $0xa8] sm:$0xff]  ;;  %v2515_v39 = vld [vmem:[#allocation14 + $0x50] sm:$0xff] }
  0xe4   :  { %v364_v42 = vadd.f32 %v360_v41, %v325_v40  ;;  %v2519_v40 = vld [vmem:[#allocation14 + $0xa0] sm:$0xff]  ;;  %643 = vmatpush.msra.mxu0 %v2511_v38 }
  0xe5   :  { %606 = vmatpush.msrb.mxu3 %v2500_v32  ;;  %v921_v41 = vld [vmem:[#allocation6 + $0x28] sm:$0x3f] }
  0xe6   :  { %v399_v43 = vpop.f32.mrf.mxu2  ;;  %644 = vmatpush.msra.mxu0 %v2519_v40 }
  0xe7   :  { %v403_v44 = vadd.f32 %v399_v43, %v364_v42  ;;  %607 = vmatpush.msrb.mxu3 %v2508_v37 }
  0xe9   :  { %v405_v45 = vmax.f32 %v403_v44, 0.0  ;;  %608 = vmatpush.msrb.mxu3 %v2515_v39 }
  0xea   :  { %v411_v46 = vld [vmem:[#allocation2] sm:$0xff] }
  0xeb   :  { %409 = vst.msk [vmem:[#allocation2 + $0x8] sm:$0xf] %vm408_vm3, %v405_v45  ;;  %1616 = vmatmul.msk.f32.vlgmr.msra.gmra.mxu3 %vm406_vm2, %v411_v46 }
  0xec   :  { %1637 = vmatpush.msk.msra.mxu3 %vm294_vm0, %v921_v41 }
  0xee   :  { %946 = vmatpush.msra.mxu3 %v2332_v2  ;;  %v1630_v2 = vld [vmem:[%s3176_s8 + $0x11] sm:$0xff] }
  0xf2   :  { %v412_v47 = vld [vmem:[#allocation2 + $0x8] sm:$0x3]  ;;  %v494_v51 = vld [vmem:[#allocation2 + $0xa] sm:$0x3] }
  0xf3   :  { %v453_v48 = vld [vmem:[#allocation2 + $0x1] sm:$0xff]  ;;  %1617 = vmatmul.msk.f32.gmra.mxu3 %vm406_vm2, %v412_v47  ;;  %v454_v50 = vld [vmem:[#allocation2 + $0x9] sm:$0x3] }
  0xf4   :  { %v493_v49 = vld [vmem:[#allocation2 + $0x2] sm:$0xff]  ;;  %1618 = vmatmul.msk.f32.vlgmr.msrb.gmra.mxu0 %vm406_vm2, %v453_v48 }
  0xf5   :  { %1620 = vmatmul.msk.f32.vlgmr.msrb.gmra.mxu1 %vm406_vm2, %v493_v49  ;;  %1027 = vmatpush.msrb.mxu0 %v2374_v14 }
  0xf6   :  { %1066 = vmatpush.msrb.mxu1 %v2378_v16 }
  0xf7   :  { %1028 = vmatpush.msrb.mxu0 %v2389_v19 }
  0xf8   :  { %1067 = vmatpush.msrb.mxu1 %v2391_v20 }
  0xf9   :  { %1029 = vmatpush.msrb.mxu0 %v2397_v22 }
  0xfa   :  { %1068 = vmatpush.msrb.mxu1 %v2402_v24 }
  0xfb   :  { %1030 = vmatpush.msrb.mxu0 %v2400_v23 }
  0xfc   :  { %1619 = vmatmul.msk.f32.gmra.mxu0 %vm406_vm2, %v454_v50  ;;  %1069 = vmatpush.msrb.mxu1 %v2406_v25 }
  0xfd   :  { %1621 = vmatmul.msk.f32.gmra.mxu1 %vm406_vm2, %v494_v51  ;;  %1031 = vmatpush.msrb.mxu0 %v2408_v26 }
  0xfe   :  { %1070 = vmatpush.msrb.mxu1 %v2410_v27  ;;  %v1631_v27 = vld [vmem:[%s3176_s8 + $0x19] sm:$0xf] }
  0xff   :  { %1032 = vmatpush.msrb.mxu0 %v2414_v28  ;;  %v1625_v28 = vld [vmem:[%s3176_s8 + $0x10] sm:$0xff] }
 0x100   :  { %1071 = vmatpush.msrb.mxu1 %v2416_v29 }
 0x105   :  { %1633 = vmatmul.msk.f32.vlgmr.msra.gmra.mxu1 %vm287_vm1, %v1630_v2 }
 0x10d   :  { %1634 = vmatmul.msk.f32.gmra.mxu1 %vm287_vm1, %v1631_v27 }
 0x16e   :  { %v442_v7 = vpop.f32.mrf.mxu3 }
 0x16f   :  { %v451_v16 = vadd.f32 %v1677_v4, %v442_v7 }
 0x171   :  { %v485_v14 = vpop.f32.mrf.mxu0 }
 0x172   :  { %v491_v20 = vadd.f32 %v485_v14, %v451_v16  ;;  %v525_v24 = vpop.f32.mrf.mxu1 }
 0x174   :  { %v531_v19 = vadd.f32 %v525_v24, %v491_v20 }
 0x176   :  { %v533_v22 = vmax.f32 %v531_v19, 0.0  ;;  %v445_v25 = vpop.f32.mrf.mxu3 }
 0x177   :  { %v452_v23 = vadd.f32 %v1677_v4, %v445_v25 }
 0x178   :  { %536 = vst.msk [vmem:[#allocation3] sm:$0xff] %vm535_vm4, %v533_v22 }
 0x179   :  { %v488_v29 = vpop.f32.mrf.mxu0 }
 0x17a   :  { %v492_v42 = vadd.f32 %v488_v29, %v452_v23  ;;  %v528_v43 = vpop.f32.mrf.mxu1  ;;  %v1681_v23 = vld [vmem:[#allocation15] ss:$0 sm:$0xff] }
 0x17c   :  { %v532_v44 = vadd.f32 %v528_v43, %v492_v42 }
 0x17e   :  { %v534_v26 = vmax.f32 %v532_v44, 0.0 }
 0x17f   :  { %v540_v45 = vld [vmem:[#allocation3] sm:$0xff] }
 0x180   :  { %538 = vst.msk [vmem:[#allocation3 + $0x8] sm:$0x3] %vm537_vm5, %v534_v26  ;;  %1622 = vmatmul.msk.f32.vlgmr.msrb.gmra.mxu2 %vm535_vm4, %v540_v45 }
 0x181   :  { %985 = vmatpush.msrb.mxu2 %v2368_v12  ;;  %v1635_v12 = vld [vmem:[%s3176_s8 + $0x12] sm:$0xff] }
 0x182   :  { %v910_v49 = vpop.f32.mrf.mxu1 }
 0x183   :  { %986 = vmatpush.msrb.mxu2 %v2371_v13  ;;  %v1626_v13 = vld [vmem:[%s3176_s8 + $0x18] sm:$0xf] }
 0x185   :  { %987 = vmatpush.msrb.mxu2 %v2376_v15  ;;  %v1636_v15 = vld [vmem:[%s3176_s8 + $0x1a] sm:$0xf]  ;;  %s2136_s8 = smov 112  }
 0x187   :  { %v578_v46 = vld [vmem:[#allocation3 + $0x1] sm:$0xff]  ;;  %988 = vmatpush.msrb.mxu2 %v2383_v17 }
 0x188   :  { %v614_v47 = vld [vmem:[#allocation3 + $0x2] sm:$0xff]  ;;  %1623 = vmatmul.msk.f32.vlgmr.msrb.gmra.mxu3 %vm535_vm4, %v578_v46  ;;  %1628 = vmatmul.msk.f32.vlgmr.msra.gmra.mxu2 %vm287_vm1, %v1625_v28 }
 0x189   :  { %1624 = vmatmul.msk.f32.vlgmr.msra.gmra.mxu0 %vm535_vm4, %v614_v47  ;;  %1106 = vmatpush.msrb.mxu3 %v2422_v35 }
 0x18a   :  { %989 = vmatpush.msrb.mxu2 %v2386_v18  ;;  %1179 = vmatpush.msra.mxu0 %v2446_v57  ;;  %v1678_v18 = vld [vmem:[#allocation15] ss:$0 sm:$0xff] }
 0x18b   :  { %1107 = vmatpush.msrb.mxu3 %v2433_v52 }
 0x18c   :  { %990 = vmatpush.msrb.mxu2 %v2393_v21  ;;  %1180 = vmatpush.msra.mxu0 %v2455_v60  ;;  %v1679_v21 = vld [vmem:[#allocation9] ss:$0 sm:$0xff] }
 0x18d   :  { %1108 = vmatpush.msrb.mxu3 %v2436_v53 }
 0x18e   :  { %1144 = vmatpush.msra.mxu2 %v2444_v56  ;;  %1181 = vmatpush.msra.mxu0 %v2464_v63 }
 0x18f   :  { %1109 = vmatpush.msrb.mxu3 %v2439_v54 }
 0x190   :  { %1145 = vmatpush.msra.mxu2 %v2453_v59  ;;  %1638 = vmatmul.msk.f32.vlgmr.msra.gmra.mxu3 %vm287_vm1, %v1635_v12 }
 0x191   :  { %1182 = vmatpush.msra.mxu0 %v2473_v3  ;;  %1629 = vmatmul.msk.f32.gmra.mxu2 %vm287_vm1, %v1626_v13 }
 0x192   :  { %1110 = vmatpush.msrb.mxu3 %v2442_v55  ;;  %1146 = vmatpush.msra.mxu2 %v2462_v62 }
 0x193   :  { %1183 = vmatpush.msra.mxu0 %v2482_v8 }
 0x194   :  { %1111 = vmatpush.msrb.mxu3 %v2451_v58  ;;  %1147 = vmatpush.msra.mxu2 %v2471_v1 }
 0x195   :  { %1184 = vmatpush.msra.mxu0 %v2491_v11 }
 0x196   :  { %1112 = vmatpush.msrb.mxu3 %v2460_v61  ;;  %1148 = vmatpush.msra.mxu2 %v2480_v6  ;;  %v913_v61 = vpop.f32.mrf.mxu1 }
 0x197   :  { %1185 = vmatpush.msra.mxu0 %v2497_v31 }
 0x198   :  { %1113 = vmatpush.msrb.mxu3 %v2469_v0  ;;  %1149 = vmatpush.msra.mxu2 %v2489_v10 }
 0x199   :  { %1639 = vmatmul.msk.f32.gmra.mxu3 %vm287_vm1, %v1636_v15  ;;  %1186 = vmatpush.msra.mxu0 %v2503_v36 }
 0x19a   :  { %1114 = vmatpush.msrb.mxu3 %v2478_v5  ;;  %1150 = vmatpush.msra.mxu2 %v2495_v30 }
 0x19b   :  { %1187 = vmatpush.msra.mxu0 %v2511_v38 }
 0x19c   :  { %1115 = vmatpush.msrb.mxu3 %v2487_v9  ;;  %1151 = vmatpush.msra.mxu2 %v2500_v32 }
 0x19d   :  { %1188 = vmatpush.msra.mxu0 %v2519_v40 }
 0x19e   :  { %1152 = vmatpush.msra.mxu2 %v2508_v37 }
 0x1a0   :  { %1153 = vmatpush.msra.mxu2 %v2515_v39 }
 0x203   :  { %v571_v17 = vpop.f32.mrf.mxu2 }
 0x204   :  { %v577_v35 = vadd.f32 %v1678_v18, %v571_v17 }
 0x206   :  { %v646_v52 = vpop.f32.mrf.mxu0 }
 0x20b   :  { %v610_v48 = vpop.f32.mrf.mxu3  ;;  %v869_v51 = vpop.f32.mrf.mxu2 }
 0x20c   :  { %v613_v50 = vadd.f32 %v610_v48, %v577_v35  ;;  %v878_v53 = vadd.f32 %v1679_v21, %v869_v51 }
 0x20e   :  { %v649_v54 = vadd.f32 %v646_v52, %v613_v50  ;;  %v916_v56 = vadd.f32 %v910_v49, %v878_v53 }
 0x210   :  { %v650_v55 = vmax.f32 %v649_v54, 0.0 }
 0x212   :  { %652 = vst.msk [vmem:[#allocation4] sm:$0xff] %vm651_vm6, %v650_v55 }
 0x213   :  { %v948_v57 = vpop.f32.mrf.mxu3 }
 0x214   :  { %v954_v58 = vadd.f32 %v948_v57, %v916_v56  ;;  %v872_v59 = vpop.f32.mrf.mxu2 }
 0x215   :  { %v879_v60 = vadd.f32 %v1679_v21, %v872_v59 }
 0x216   :  { %v956_v62 = vmax.f32 %v954_v58, 0.0 }
 0x217   :  { %v917_v63 = vadd.f32 %v913_v61, %v879_v60 }
 0x218   :  { %958 = vst.msk [vmem:[#allocation2] sm:$0xff] %vm406_vm2, %v956_v62 }
 0x219   :  { %v2605_v0 = vld [vmem:[#allocation4 + $0x4] sm:$0x1]  ;;  %v2609_v1 = vld [vmem:[#allocation4] sm:$0x1]  ;;  %v2615_v9 = vld [vmem:[#allocation4 + $0x6] sm:$0x1] }
 0x21a   :  { %739 = vrot.lane.b32.xlu2 %v2605_v0, %s2135_s3  ;;  %659 = vrot.lane.b32.xlu1 %v2609_v1, %s2135_s3  ;;  %v2629_v45 = vld [vmem:[#allocation4 + $0x1] sm:$0x1]  ;;  %v2631_v28 = vld [vmem:[#allocation4 + $0x2] sm:$0x1]  ;;  %v2633_v47 = vld [vmem:[#allocation4 + $0x3] sm:$0x1] }
 0x21b   :  { %v2635_v12 = vld [vmem:[#allocation4 + $0x5] sm:$0x1]  ;;  %v2637_v13 = vld [vmem:[#allocation4 + $0x7] sm:$0x1] }
 0x21c   :  { %v951_v3 = vpop.f32.mrf.mxu3 }
 0x21d   :  { %v955_v5 = vadd.f32 %v951_v3, %v917_v63 }
 0x21f   :  { %v957_v6 = vmax.f32 %v955_v5, 0.0  ;;  %v961_v8 = vld [vmem:[#allocation2] sm:$0xff] }
 0x220   :  { %1640 = vmatmul.msk.f32.vlgmr.msrb.gmra.mxu2 %vm406_vm2, %v961_v8 }
 0x221   :  { %959 = vst.msk [vmem:[#allocation2 + $0x8] sm:$0xf] %vm408_vm3, %v957_v6 }
 0x222   :  { %779 = vrot.lane.b32.xlu2 %v2615_v9, %s2135_s3 }
 0x228   :  { %v962_v10 = vld [vmem:[#allocation2 + $0x8] sm:$0x3]  ;;  %v1043_v32 = vld [vmem:[#allocation2 + $0xa] sm:$0x3] }
 0x229   :  { %v1003_v11 = vld [vmem:[#allocation2 + $0x1] sm:$0xff]  ;;  %1641 = vmatmul.msk.f32.gmra.mxu2 %vm406_vm2, %v962_v10  ;;  %v1004_v31 = vld [vmem:[#allocation2 + $0x9] sm:$0x3] }
 0x22a   :  { %v1042_v30 = vld [vmem:[#allocation2 + $0x2] sm:$0xff]  ;;  %1642 = vmatmul.msk.f32.vlgmr.msrb.gmra.mxu0 %vm406_vm2, %v1003_v11 }
 0x22b   :  { %1644 = vmatmul.msk.f32.vlgmr.msrb.gmra.mxu1 %vm406_vm2, %v1042_v30 }
 0x232   :  { %1643 = vmatmul.msk.f32.gmra.mxu0 %vm406_vm2, %v1004_v31 }
 0x233   :  { %1645 = vmatmul.msk.f32.gmra.mxu1 %vm406_vm2, %v1043_v32 }
 0x274   :  { %v2648_v18 = vpop.permute.xlu2 %739 }
 0x275   :  { %vm742_vm12 = vcmp.gt.f32.partialorder %v2605_v0, %v2648_v18 }
 0x276   :  { %v750_v60 = vsel %vm742_vm12, %v2605_v0, %v2648_v18 }
 0x27c   :  { %v2670_v50 = vpop.permute.xlu2 %779 }
 0x27d   :  { %vm782_vm8 = vcmp.gt.f32.partialorder %v2615_v9, %v2670_v50 }
 0x27e   :  { %v790_v51 = vsel %vm782_vm8, %v2615_v9, %v2670_v50 }
 0x28c   :  { %v2656_v35 = vpop.permute.xlu1 %659 }
 0x28d   :  { %vm662_vm7 = vcmp.gt.f32.partialorder %v2609_v1, %v2656_v35 }
 0x28e   :  { %v670_v48 = vsel %vm662_vm7, %v2609_v1, %v2656_v35 }
 0x2a3   :  { %v992_v34 = vpop.f32.mrf.mxu2 }
 0x2a4   :  { %v1001_v36 = vadd.f32 %v1680_v33, %v992_v34 }
 0x2a7   :  { %v1034_v37 = vpop.f32.mrf.mxu0 }
 0x2a8   :  { %v1040_v38 = vadd.f32 %v1034_v37, %v1001_v36  ;;  %v1073_v39 = vpop.f32.mrf.mxu1 }
 0x2aa   :  { %v1079_v40 = vadd.f32 %v1073_v39, %v1040_v38 }
 0x2ac   :  { %v1081_v41 = vmax.f32 %v1079_v40, 0.0  ;;  %v995_v4 = vpop.f32.mrf.mxu2 }
 0x2ad   :  { %v1002_v7 = vadd.f32 %v1680_v33, %v995_v4 }
 0x2ae   :  { %1083 = vst.msk [vmem:[#allocation3] sm:$0xff] %vm535_vm4, %v1081_v41 }
 0x2af   :  { %v1037_v16 = vpop.f32.mrf.mxu0 }
 0x2b0   :  { %v1041_v14 = vadd.f32 %v1037_v16, %v1002_v7  ;;  %v1076_v2 = vpop.f32.mrf.mxu1 }
 0x2b2   :  { %v1080_v20 = vadd.f32 %v1076_v2, %v1041_v14 }
 0x2b4   :  { %v1082_v24 = vmax.f32 %v1080_v20, 0.0 }
 0x2b5   :  { %v1086_v19 = vld [vmem:[#allocation3] sm:$0xff] }
 0x2b6   :  { %1084 = vst.msk [vmem:[#allocation3 + $0x8] sm:$0x3] %vm537_vm5, %v1082_v24  ;;  %1646 = vmatmul.msk.f32.vlgmr.msrb.gmra.mxu3 %vm535_vm4, %v1086_v19 }
 0x2bd   :  { %v1124_v22 = vld [vmem:[#allocation3 + $0x1] sm:$0xff] }
 0x2be   :  { %v1159_v25 = vld [vmem:[#allocation3 + $0x2] sm:$0xff]  ;;  %1647 = vmatmul.msk.f32.vlgmr.msra.gmra.mxu2 %vm535_vm4, %v1124_v22 }
 0x2bf   :  { %1648 = vmatmul.msk.f32.vlgmr.msra.gmra.mxu0 %vm535_vm4, %v1159_v25 }
 0x339   :  { %v1117_v27 = vpop.f32.mrf.mxu3 }
 0x33a   :  { %v1123_v29 = vadd.f32 %v1681_v23, %v1117_v27  ;;  %v2860_v23 = vld [vmem:[#allocation17] sm:$0x1] }
 0x33b   :  { %v734_v27 = vadd.s32 32, %v2860_v23  ;;  %v656_v50 = vadd.s32 8, %v2860_v23 }
 0x33c   :  { %v1190_v44 = vpop.f32.mrf.mxu0 }
 0x33d   :  { %v657_v0 = vadd.s32 1, %v656_v50 }
 0x33f   :  { %v685_v18 = vperm.slane %v657_v0, 0 }
 0x341   :  { %v1155_v42 = vpop.f32.mrf.mxu2 }
 0x342   :  { %v1158_v43 = vadd.f32 %v1155_v42, %v1123_v29 }
 0x344   :  { %v1193_v26 = vadd.f32 %v1190_v44, %v1158_v43  ;;  %v655_v43 = vadd.s32 1, %v2860_v23  ;;  %v735_v44 = vadd.s32 1, %v734_v27 }
 0x346   :  { %v1194_v46 = vmax.f32 %v1193_v26, 0.0  ;;  %v743_v26 = vperm.slane %v735_v44, 0 }
 0x348   :  { %1195 = vst.msk [vmem:[#allocation4] sm:$0xff] %vm651_vm6, %v1194_v46  ;;  %v663_v46 = vperm.slane %v655_v43, 0 }
 0x34f   :  { %v2640_v15 = vld [vmem:[#allocation4 + $0x6] sm:$0x1]  ;;  %v2642_v17 = vld [vmem:[#allocation4] sm:$0x1]  ;;  %v2650_v21 = vld [vmem:[#allocation4 + $0x4] sm:$0x1] }
 0x350   :  { %1280 = vrot.lane.b32.xlu1 %v2640_v15, %s2135_s3  ;;  %1199 = vrot.lane.b32.xlu0 %v2642_v17, %s2135_s3  ;;  %v2665_v49 = vld [vmem:[#allocation4 + $0x2] sm:$0x1]  ;;  %v2758_v8 = vld [vmem:[#allocation4 + $0x1] sm:$0x1]  ;;  %v2770_v30 = vld [vmem:[#allocation4 + $0x7] sm:$0x1] }
 0x351   :  { %v2782_v33 = vld [vmem:[#allocation4 + $0x3] sm:$0x1]  ;;  %v2794_v37 = vld [vmem:[#allocation4 + $0x5] sm:$0x1] }
 0x358   :  { %699 = vrot.lane.b32.xlu1 %v2631_v28, %s2135_s3  ;;  %1253 = vrot.lane.b32.xlu0 %v2650_v21, %s2135_s3 }
 0x360   :  { %672 = vrot.lane.b32.xlu1 %v670_v48, %s2136_s8  ;;  %1226 = vrot.lane.b32.xlu0 %v2665_v49, %s2135_s3 }
 0x368   :  { %792 = vrot.lane.b32.xlu1 %v790_v51, %s2136_s8  ;;  %v774_v51 = vadd.s32 48, %v2860_v23 }
 0x3c2   :  { %v2680_v52 = vpop.permute.xlu0 %1199  ;;  %v2690_v54 = vpop.permute.xlu1 %1280 }
 0x3c3   :  { %vm1202_vm9 = vcmp.gt.f32.partialorder %v2642_v17, %v2680_v52  ;;  %vm1283_vm10 = vcmp.gt.f32.partialorder %v2640_v15, %v2690_v54 }
 0x3c4   :  { %v1204_v53 = vsel %vm1202_vm9, %v2642_v17, %v2680_v52  ;;  %v1285_v56 = vsel %vm1283_vm10, %v2640_v15, %v2690_v54  ;;  %v1389_v54 = vld [vmem:[%s3127_s10 + $0x78] sm:$0xff] }
 0x3c5   :  { %1206 = vrot.lane.b32.xlu2 %v1204_v53, %s2136_s8  ;;  %1394 = vmatpush.msra.mxu3 %v1389_v54 }
 0x3ca   :  { %v2694_v55 = vpop.permute.xlu0 %1253  ;;  %v2712_v58 = vpop.permute.xlu1 %699 }
 0x3cb   :  { %vm1256_vm11 = vcmp.gt.f32.partialorder %v2650_v21, %v2694_v55  ;;  %vm702_vm14 = vcmp.gt.f32.partialorder %v2631_v28, %v2712_v58 }
 0x3cc   :  { %v1258_v57 = vsel %vm1256_vm11, %v2650_v21, %v2694_v55  ;;  %v710_v63 = vsel %vm702_vm14, %v2631_v28, %v2712_v58  ;;  %v1387_v28 = vld [vmem:[%s3127_s10 + $0x68] sm:$0xff]  ;;  %v736_v55 = vadd.s32 40, %v2860_v23  ;;  %v1386_v58 = vld [vmem:[%s3127_s10 + $0x60] sm:$0xff] }
 0x3cd   :  { %1287 = vrot.lane.b32.xlu2 %v1285_v56, %s2136_s8  ;;  %1260 = vrot.lane.b32.xlu0 %v1258_v57, %s2136_s8  ;;  %v786_v56 = vperm.slane %v774_v51, 0  ;;  %v1682_v57 = vld [vmem:[#allocation17] ss:$0 sm:$0xff] }
 0x3d2   :  { %v2714_v59 = vpop.permute.xlu0 %1226  ;;  %v2732_v62 = vpop.permute.xlu1 %672 }
 0x3d3   :  { %vm1229_vm13 = vcmp.gt.f32.partialorder %v2665_v49, %v2714_v59  ;;  %vm675_vm15 = vcmp.gt.f32.partialorder %v2629_v45, %v2732_v62 }
 0x3d4   :  { %v1231_v61 = vsel %vm1229_vm13, %v2665_v49, %v2714_v59  ;;  %v679_v3 = vsel %vm675_vm15, %v2629_v45, %v2732_v62  ;;  %v1388_v49 = vld [vmem:[%s3127_s10 + $0x70] sm:$0xff]  ;;  %v737_v59 = vadd.s32 1, %v736_v55 }
 0x3d5   :  { %752 = vrot.lane.b32.xlu0 %v750_v60, %s2136_s8  ;;  %1233 = vrot.lane.b32.xlu2 %v1231_v61, %s2136_s8  ;;  %v746_v60 = vperm.slane %v734_v27, 0  ;;  %v694_v61 = vadd.s32 16, %v2860_v23  ;;  %v1337_v27 = vld [vmem:[#allocation18] sm:$0xff] }
 0x3d6   :  { %1395 = vmatpush.msra.mxu3 %v1388_v49 }
 0x3d8   :  { %1396 = vmatpush.msra.mxu3 %v1387_v28 }
 0x3da   :  { %v2748_v5 = vpop.permute.xlu1 %792  ;;  %1397 = vmatpush.msra.mxu3 %v1386_v58  ;;  %v1420_v58 = vld [vmem:[#allocation23 + $0x28] sm:$0xff] }
 0x3db   :  { %vm3149_vm0 = vcmp.gt.f32.partialorder %v2637_v13, %v2748_v5 }
 0x3dc   :  { %v799_v6 = vsel %vm3149_vm0, %v2637_v13, %v2748_v5 }
 0x3dd   :  { %712 = vrot.lane.b32.xlu0 %v710_v63, %s2136_s8  ;;  %v775_v63 = vadd.s32 1, %v774_v51 }
 0x3e5   :  { %681 = vrot.lane.b32.xlu0 %v679_v3, %s2135_s3  ;;  %v695_v3 = vadd.s32 1, %v694_v61 }
 0x3ed   :  { %801 = vrot.lane.b32.xlu0 %v799_v6, %s2135_s3  ;;  %v783_v6 = vperm.slane %v775_v63, 0 }
 0x41f   :  { %v2760_v10 = vpop.permute.xlu2 %1206 }
 0x420   :  { %vm1209_vm1 = vcmp.gt.f32.partialorder %v2758_v8, %v2760_v10 }
 0x421   :  { %v1213_v11 = vsel %vm1209_vm1, %v2758_v8, %v2760_v10 }
 0x422   :  { %1215 = vrot.lane.b32.xlu1 %v1213_v11, %s2135_s3  ;;  %v703_v11 = vperm.slane %v695_v3, 0 }
 0x427   :  { %v2772_v31 = vpop.permute.xlu2 %1287 }
 0x428   :  { %vm3144_vm3 = vcmp.gt.f32.partialorder %v2770_v30, %v2772_v31 }
 0x429   :  { %v1294_v32 = vsel %vm3144_vm3, %v2770_v30, %v2772_v31 }
 0x42a   :  { %1296 = vrot.lane.b32.xlu1 %v1294_v32, %s2135_s3  ;;  %v706_v32 = vperm.slane %v694_v61, 0 }
 0x42f   :  { %v2784_v34 = vpop.permute.xlu2 %1233 }
 0x430   :  { %vm3143_vm4 = vcmp.gt.f32.partialorder %v2782_v33, %v2784_v34 }
 0x431   :  { %v1240_v36 = vsel %vm3143_vm4, %v2782_v33, %v2784_v34 }
 0x432   :  { %1242 = vrot.lane.b32.xlu1 %v1240_v36, %s2135_s3  ;;  %v1344_v36 = vld [vmem:[#allocation18 + $0x38] sm:$0xff] }
 0x433   :  { %1361 = vmatpush.msra.mxu1 %v1344_v36 }
 0x43f   :  { %v2796_v38 = vpop.permute.xlu0 %1260 }
 0x440   :  { %vm3155_vm5 = vcmp.gt.f32.partialorder %v2794_v37, %v2796_v38 }
 0x441   :  { %v1267_v39 = vsel %vm3155_vm5, %v2794_v37, %v2796_v38  ;;  %vm1349_vm5 = vcmask 523264  }
 0x442   :  { %1269 = vrot.lane.b32.xlu2 %v1267_v39, %s2135_s3  ;;  %v1343_v39 = vld [vmem:[#allocation18 + $0x30] sm:$0xff] }
 0x443   :  { %1362 = vmatpush.msra.mxu1 %v1343_v39 }
 0x447   :  { %v2806_v40 = vpop.permute.xlu0 %752 }
 0x448   :  { %vm3145_vm4 = vcmp.gt.f32.partialorder %v2635_v12, %v2806_v40 }
 0x449   :  { %v759_v41 = vsel %vm3145_vm4, %v2635_v12, %v2806_v40 }
 0x44a   :  { %761 = vrot.lane.b32.xlu2 %v759_v41, %s2135_s3  ;;  %v1342_v41 = vld [vmem:[#allocation18 + $0x28] sm:$0xff] }
 0x44b   :  { %1363 = vmatpush.msra.mxu1 %v1342_v41 }
 0x44f   :  { %v2816_v4 = vpop.permute.xlu0 %712 }
 0x450   :  { %vm3146_vm3 = vcmp.gt.f32.partialorder %v2633_v47, %v2816_v4 }
 0x451   :  { %v719_v7 = vsel %vm3146_vm3, %v2633_v47, %v2816_v4 }
 0x452   :  { %721 = vrot.lane.b32.xlu2 %v719_v7, %s2135_s3  ;;  %v1341_v7 = vld [vmem:[#allocation18 + $0x20] sm:$0xff] }
 0x453   :  { %1364 = vmatpush.msra.mxu1 %v1341_v7 }
 0x457   :  { %v2826_v16 = vpop.permute.xlu0 %681 }
 0x458   :  { %vm3147_vm4 = vcmp.gt.f32.partialorder %v2629_v45, %v2826_v16 }
 0x459   :  { %v691_v14 = vsel %vm3147_vm4, %v2629_v45, %v2826_v16 }
 0x45a   :  { %813 = vrot.lane.b32.xlu2 %v691_v14, %s2136_s8  ;;  %v1340_v14 = vld [vmem:[#allocation18 + $0x18] sm:$0xff] }
 0x45b   :  { %1365 = vmatpush.msra.mxu1 %v1340_v14 }
 0x45f   :  { %v2836_v2 = vpop.permute.xlu0 %801 }
 0x460   :  { %vm3148_vm3 = vcmp.gt.f32.partialorder %v2637_v13, %v2836_v2 }
 0x461   :  { %v811_v20 = vsel %vm3148_vm3, %v2637_v13, %v2836_v2 }
 0x462   :  { %821 = vrot.lane.b32.xlu2 %v811_v20, %s2137_s28  ;;  %v1339_v20 = vld [vmem:[#allocation18 + $0x10] sm:$0xff] }
 0x463   :  { %1366 = vmatpush.msra.mxu1 %v1339_v20 }
 0x46a   :  { %744 = vrot.lane.b32.xlu2 %v743_v26, %s2135_s3 }
 0x472   :  { %787 = vrot.lane.b32.xlu2 %v786_v56, %s2135_s3 }
 0x494   :  { %v2846_v24 = vpop.permute.xlu1 %1215 }
 0x495   :  { %vm3153_vm4 = vcmp.gt.f32.partialorder %v2758_v8, %v2846_v24 }
 0x496   :  { %v1222_v19 = vsel %vm3153_vm4, %v2758_v8, %v2846_v24 }
 0x497   :  { %1305 = vrot.lane.b32.xlu0 %v1222_v19, %s2136_s8  ;;  %v1338_v19 = vld [vmem:[#allocation18 + $0x8] sm:$0xff] }
 0x498   :  { %1367 = vmatpush.msra.mxu1 %v1338_v19 }
 0x49a   :  { %1368 = vmatpush.msra.mxu1 %v1337_v27 }
 0x49c   :  { %v2856_v22 = vpop.permute.xlu1 %1296  ;;  %v2858_v25 = vpop.permute.xlu2 %1269 }
 0x49d   :  { %vm3150_vm3 = vcmp.gt.f32.partialorder %v2770_v30, %v2856_v22  ;;  %vm3152_vm0 = vcmp.gt.f32.partialorder %v2794_v37, %v2858_v25 }
 0x49e   :  { %v1303_v29 = vsel %vm3150_vm3, %v2770_v30, %v2856_v22  ;;  %v1276_v42 = vsel %vm3152_vm0, %v2794_v37, %v2858_v25  ;;  %vm824_vm0 = vcmask 130048  }
 0x49f   :  { %1313 = vrot.lane.b32.xlu0 %v1303_v29, %s2137_s28  ;;  %1309 = vrot.lane.b32.xlu1 %v1276_v42, %s2135_s3 }
 0x4a4   :  { %v2881_v48 = vpop.permute.xlu2 %761  ;;  %v2902_v42 = vpop.permute.xlu1 %1242 }
 0x4a5   :  { %vm3151_vm3 = vcmp.gt.f32.partialorder %v2635_v12, %v2881_v48 }
 0x4a6   :  { %v771_v53 = vsel %vm3151_vm3, %v2635_v12, %v2881_v48  ;;  %vm3154_vm3 = vcmp.gt.f32.partialorder %v2782_v33, %v2902_v42 }
 0x4a7   :  { %817 = vrot.lane.b32.xlu1 %v771_v53, %s2135_s3  ;;  %664 = vrot.lane.b32.xlu0 %v663_v46, %s2135_s3  ;;  %v1249_v51 = vsel %vm3154_vm3, %v2782_v33, %v2902_v42  ;;  %vm1331_vm3 = vcmask 1040384  }
 0x4ac   :  { %v2900_v29 = vpop.permute.xlu2 %721 }
 0x4ad   :  { %vm724_vm4 = vcmp.gt.f32.partialorder %v2633_v47, %v2900_v29 }
 0x4ae   :  { %v731_v61 = vsel %vm724_vm4, %v2633_v47, %v2900_v29  ;;  %v1685_v29 = vld [vmem:[%s3130_s13] ss:$0 sm:$0xff] }
 0x4af   :  { %667 = vrot.lane.b32.xlu1 %v1682_v57, %s2135_s3  ;;  %747 = vrot.lane.b32.xlu0 %v746_v60, %s2135_s3 }
 0x4b4   :  { %v814_v44 = vpop.permute.xlu2 %813 }
 0x4b5   :  { %v825_v63 = vsel %vm824_vm0, %v814_v44, %v731_v61  ;;  %v1379_v61 = vld [vmem:[%s3127_s10 + $0x28] sm:$0xff] }
 0x4b7   :  { %784 = vrot.lane.b32.xlu1 %v783_v6, %s2135_s3  ;;  %704 = vrot.lane.b32.xlu0 %v703_v11, %s2135_s3 }
 0x4bc   :  { %v822_v57 = vpop.permute.xlu2 %821 }
 0x4bf   :  { %707 = vrot.lane.b32.xlu1 %v706_v32, %s2135_s3 }
 0x4c4   :  { %v745_v41 = vpop.permute.xlu2 %744 }
 0x509   :  { %v1306_v43 = vpop.permute.xlu0 %1305 }
 0x50a   :  { %v1316_v53 = vsel %vm824_vm0, %v1306_v43, %v1249_v51  ;;  %v788_v43 = vpop.permute.xlu2 %787  ;;  %v1384_v51 = vld [vmem:[%s3127_s10 + $0x50] sm:$0xff] }
 0x511   :  { %v1310_v26 = vpop.permute.xlu1 %1309  ;;  %v1314_v46 = vpop.permute.xlu0 %1313 }
 0x512   :  { %v1317_v56 = vsel %vm651_vm6, %v1316_v53, %v1310_v26  ;;  %v1385_v26 = vld [vmem:[%s3127_s10 + $0x58] sm:$0xff]  ;;  %v1383_v53 = vld [vmem:[%s3127_s10 + $0x48] sm:$0xff] }
 0x513   :  { %v1318_v60 = vsel %vm406_vm2, %v1317_v56, %v1314_v46  ;;  %v765_v46 = vperm.slane %v737_v59, 0  ;;  %1398 = vmatpush.msra.mxu3 %v1385_v26  ;;  %v1382_v56 = vld [vmem:[%s3127_s10 + $0x40] sm:$0xff] }
 0x514   :  { %v1329_v11 = vrot.slane %v1318_v60, 7  ;;  %v1380_v60 = vld [vmem:[%s3127_s10 + $0x30] sm:$0xff]  ;;  %v1419_v59 = vld [vmem:[#allocation23 + $0x20] sm:$0xff] }
 0x515   :  { %1399 = vmatpush.msra.mxu3 %v1384_v51  ;;  %v1415_v51 = vld [vmem:[#allocation23] sm:$0xff] }
 0x517   :  { %1400 = vmatpush.msra.mxu3 %v1383_v53 }
 0x519   :  { %v818_v3 = vpop.permute.xlu1 %817  ;;  %v665_v6 = vpop.permute.xlu0 %664  ;;  %1401 = vmatpush.msra.mxu3 %v1382_v56 }
 0x51a   :  { %v826_v32 = vsel %vm651_vm6, %v825_v63, %v818_v3  ;;  %v776_v63 = vadd.s32 56, %v2860_v23 }
 0x51b   :  { %v827_v36 = vsel %vm406_vm2, %v826_v32, %v822_v57  ;;  %v1381_v57 = vld [vmem:[%s3127_s10 + $0x38] sm:$0xff] }
 0x51c   :  { %v1332_v39 = vsel %vm1331_vm3, %v827_v36, %v1329_v11  ;;  %1402 = vmatpush.msra.mxu3 %v1381_v57  ;;  %v777_v3 = vadd.s32 1, %v776_v63  ;;  %v1377_v32 = vld [vmem:[%s3127_s10 + $0x18] sm:$0xff]  ;;  %v1376_v36 = vld [vmem:[%s3127_s10 + $0x10] sm:$0xff] }
 0x51d   :  { %1649 = vmatmul.msk.f32.vlgmr.msra.gmra.mxu1 %vm1349_vm5, %v1332_v39 }
 0x51e   :  { %1403 = vmatpush.msra.mxu3 %v1380_v60  ;;  %v805_v11 = vperm.slane %v777_v3, 0 }
 0x520   :  { %1404 = vmatpush.msra.mxu3 %v1379_v61 }
 0x521   :  { %v668_v7 = vpop.permute.xlu1 %667  ;;  %v748_v14 = vpop.permute.xlu0 %747 }
 0x522   :  { %v1203_v20 = vsel %vm1202_vm9, %v665_v6, %v668_v7  ;;  %v669_v19 = vsel %vm662_vm7, %v665_v6, %v668_v7  ;;  %v1257_v27 = vsel %vm1256_vm11, %v745_v41, %v748_v14  ;;  %v749_v21 = vsel %vm742_vm12, %v745_v41, %v748_v14  ;;  %v1378_v6 = vld [vmem:[%s3127_s10 + $0x20] sm:$0xff]  ;;  %v1375_v41 = vld [vmem:[%s3127_s10 + $0x8] sm:$0xff] }
 0x523   :  { %1210 = vrot.lane.b32.xlu2 %v1203_v20, %s2136_s8  ;;  %676 = vrot.lane.b32.xlu1 %v669_v19, %s2136_s8  ;;  %v1374_v14 = vld [vmem:[%s3127_s10] sm:$0xff]  ;;  %vm3177_vm7 = vcmp.gt.f32.partialorder %v2794_v37, %v2796_v38  ;;  %vm3179_vm9 = vcmp.gt.f32.partialorder %v2770_v30, %v2772_v31  ;;  %vm3181_vm11 = vcmp.gt.f32.partialorder %v2782_v33, %v2784_v34 }
 0x524   :  { %1264 = vrot.lane.b32.xlu0 %v1257_v27, %s2136_s8  ;;  %1405 = vmatpush.msra.mxu3 %v1378_v6  ;;  %vm3182_vm12 = vcmp.gt.f32.partialorder %v2633_v47, %v2816_v4  ;;  %v1422_v34 = vld [vmem:[#allocation23 + $0x38] sm:$0xff]  ;;  %v1421_v4 = vld [vmem:[#allocation23 + $0x30] sm:$0xff] }
 0x525   :  { %1438 = vmatpush.msrb.mxu1 %v1422_v34 }
 0x526   :  { %1406 = vmatpush.msra.mxu3 %v1377_v32 }
 0x527   :  { %1439 = vmatpush.msrb.mxu1 %v1421_v4 }
 0x528   :  { %1407 = vmatpush.msra.mxu3 %v1376_v36 }
 0x529   :  { %v785_v44 = vpop.permute.xlu1 %784  ;;  %v705_v35 = vpop.permute.xlu0 %704  ;;  %1440 = vmatpush.msrb.mxu1 %v1420_v58 }
 0x52a   :  { %v1284_v17 = vsel %vm1283_vm10, %v785_v44, %v788_v43  ;;  %v789_v1 = vsel %vm782_vm8, %v785_v44, %v788_v43  ;;  %1408 = vmatpush.msra.mxu3 %v1375_v41  ;;  %v1683_v43 = vld [vmem:[#allocation20] ss:$0 sm:$0xff]  ;;  %vm3178_vm8 = vcmp.gt.f32.partialorder %v2637_v13, %v2748_v5  ;;  %vm3180_vm10 = vcmp.gt.f32.partialorder %v2635_v12, %v2806_v40 }
 0x52b   :  { %1291 = vrot.lane.b32.xlu2 %v1284_v17, %s2136_s8  ;;  %796 = vrot.lane.b32.xlu1 %v789_v1, %s2136_s8 }
 0x52c   :  { %756 = vrot.lane.b32.xlu0 %v749_v21, %s2136_s8  ;;  %1409 = vmatpush.msra.mxu3 %v1374_v14 }
 0x52d   :  { %1441 = vmatpush.msrb.mxu1 %v1419_v59 }
 0x531   :  { %v708_v52 = vpop.permute.xlu1 %707 }
 0x532   :  { %v1230_v15 = vsel %vm1229_vm13, %v705_v35, %v708_v52  ;;  %v709_v9 = vsel %vm702_vm14, %v705_v35, %v708_v52  ;;  %vm3183_vm13 = vcmp.gt.f32.partialorder %v2629_v45, %v2826_v16  ;;  %vm3184_vm14 = vcmp.gt.f32.partialorder %v2758_v8, %v2846_v24  ;;  %v1417_v45 = vld [vmem:[#allocation23 + $0x10] sm:$0xff]  ;;  %v1416_v16 = vld [vmem:[#allocation23 + $0x8] sm:$0xff] }
 0x533   :  { %1237 = vrot.lane.b32.xlu2 %v1230_v15, %s2136_s8  ;;  %v696_v15 = vadd.s32 24, %v2860_v23 }
 0x534   :  { %686 = vrot.lane.b32.xlu0 %v685_v18, %s2135_s3 }
 0x53b   :  { %716 = vrot.lane.b32.xlu2 %v709_v9, %s2136_s8 }
 0x53c   :  { %766 = vrot.lane.b32.xlu0 %v765_v46, %s2135_s3  ;;  %v1418_v46 = vld [vmem:[#allocation23 + $0x18] sm:$0xff] }
 0x53d   :  { %1442 = vmatpush.msrb.mxu1 %v1418_v46 }
 0x53f   :  { %1443 = vmatpush.msrb.mxu1 %v1417_v45 }
 0x541   :  { %1444 = vmatpush.msrb.mxu1 %v1416_v16 }
 0x543   :  { %1445 = vmatpush.msrb.mxu1 %v1415_v51 }
 0x544   :  { %806 = vrot.lane.b32.xlu0 %v805_v11, %s2135_s3 }
 0x57d   :  { %v1211_v39 = vpop.permute.xlu2 %1210 }
 0x57e   :  { %v1212_v7 = vsel %vm1209_vm1, %v656_v50, %v1211_v39  ;;  %vm3186_vm1 = vcmp.gt.f32.partialorder %v2637_v13, %v2836_v2  ;;  %v1454_v13 = vld [vmem:[#allocation24 + $0x18] sm:$0xff]  ;;  %v1453_v2 = vld [vmem:[#allocation24 + $0x10] sm:$0xff] }
 0x57f   :  { %1219 = vrot.lane.b32.xlu1 %v1212_v7, %s2135_s3  ;;  %1474 = vmatpush.msrb.mxu2 %v1454_v13 }
 0x581   :  { %1475 = vmatpush.msrb.mxu2 %v1453_v2 }
 0x585   :  { %v1292_v44 = vpop.permute.xlu2 %1291 }
 0x586   :  { %v1293_v38 = vsel %vm3179_vm9, %v776_v63, %v1292_v44  ;;  %vm3189_vm9 = vcmp.gt.f32.partialorder %v2782_v33, %v2902_v42  ;;  %v1452_v44 = vld [vmem:[#allocation24 + $0x8] sm:$0xff] }
 0x587   :  { %1476 = vmatpush.msrb.mxu2 %v1452_v44 }
 0x58d   :  { %v1238_v5 = vpop.permute.xlu2 %1237 }
 0x58e   :  { %v1239_v23 = vsel %vm3181_vm11, %v696_v15, %v1238_v5 }
 0x595   :  { %v677_v20 = vpop.permute.xlu1 %676  ;;  %v717_v31 = vpop.permute.xlu2 %716 }
 0x596   :  { %v1265_v19 = vpop.permute.xlu0 %1264  ;;  %v678_v27 = vsel %vm675_vm15, %v656_v50, %v677_v20  ;;  %v697_v50 = vadd.s32 1, %v696_v15  ;;  %v718_v40 = vsel %vm3182_vm12, %v696_v15, %v717_v31  ;;  %vm3185_vm15 = vcmp.gt.f32.partialorder %v2794_v37, %v2858_v25  ;;  %v1684_v37 = vld [vmem:[#allocation21] ss:$0 sm:$0xff]  ;;  %v1512_v15 = vld [vmem:[#allocation27] sm:$0xff]  ;;  %v1687_v31 = vld [vmem:[%s3134_s17] ss:$0 sm:$0xff] }
 0x597   :  { %688 = vrot.lane.b32.xlu2 %v678_v27, %s2135_s3  ;;  %v1266_v10 = vsel %vm3177_vm7, %v736_v55, %v1265_v19  ;;  %vm3187_vm7 = vcmp.gt.f32.partialorder %v2635_v12, %v2881_v48  ;;  %s2139_s17 = smov [#allocation32]  }
 0x598   :  { %1273 = vrot.lane.b32.xlu1 %v1266_v10, %s2135_s3  ;;  %v725_v0 = vperm.slane %v697_v50, 0  ;;  %v1686_v50 = vld [vmem:[%s3132_s15] ss:$0 sm:$0xff]  ;;  %s1575_s16 = sshll.u32 %s2139_s17, 4  ;;  %s1576_s16 = int_to_ptr.vmem [resolvable:$true] %s1575_s16 }
 0x59a   :  { %v1370_v17 = vpop.f32.mrf.mxu1 }
 0x59b   :  { %v1371_v1 = vadd.f32 %v1683_v43, %v1370_v17  ;;  %v1451_v17 = vld [vmem:[#allocation24] sm:$0xff] }
 0x59c   :  { %1477 = vmatpush.msrb.mxu2 %v1451_v17 }
 0x59d   :  { %v1373_v21 = vmax.f32 %v1371_v1, 0.0  ;;  %v797_v35 = vpop.permute.xlu1 %796 }
 0x59e   :  { %v757_v52 = vpop.permute.xlu0 %756  ;;  %v798_v62 = vsel %vm3178_vm8, %v776_v63, %v797_v35  ;;  %vm3188_vm8 = vcmp.gt.f32.partialorder %v2770_v30, %v2856_v22 }
 0x59f   :  { %1410 = vmatmul.f32.vlgmr.msra.gmra.mxu3 %v1373_v21  ;;  %808 = vrot.lane.b32.xlu0 %v798_v62, %s2135_s3  ;;  %v758_v9 = vsel %vm3180_vm10, %v736_v55, %v757_v52  ;;  %v1513_v21 = vld [vmem:[#allocation27 + $0x8] sm:$0xff] }
 0x5a0   :  { %1300 = vrot.lane.b32.xlu1 %v1293_v38, %s2135_s3  ;;  %768 = vrot.lane.b32.xlu2 %v758_v9, %s2135_s3  ;;  %v1484_v38 = vld [vmem:[#allocation26 + $0x8] sm:$0xff]  ;;  %v1483_v9 = vld [vmem:[#allocation26] sm:$0xff] }
 0x5a1   :  { %1532 = vmatpush.msra.mxu2 %v1513_v21  ;;  %1506 = vmatpush.msrb.mxu0 %v1484_v38 }
 0x5a3   :  { %1533 = vmatpush.msra.mxu2 %v1512_v15  ;;  %1507 = vmatpush.msrb.mxu0 %v1483_v9 }
 0x5a6   :  { %v687_v18 = vpop.permute.xlu0 %686 }
 0x5a8   :  { %726 = vrot.lane.b32.xlu1 %v725_v0, %s2135_s3  ;;  %1246 = vrot.lane.b32.xlu2 %v1239_v23, %s2135_s3 }
 0x5ae   :  { %v767_v26 = vpop.permute.xlu0 %766 }
 0x5b0   :  { %728 = vrot.lane.b32.xlu1 %v718_v40, %s2135_s3 }
 0x5b6   :  { %v807_v53 = vpop.permute.xlu0 %806 }
 0x5f1   :  { %v689_v54 = vpop.permute.xlu2 %688  ;;  %v1220_v28 = vpop.permute.xlu1 %1219 }
 0x5f2   :  { %v690_v49 = vsel %vm3183_vm13, %v687_v18, %v689_v54  ;;  %v1221_v55 = vsel %vm3184_vm14, %v687_v18, %v1220_v28  ;;  %v1688_v54 = vld [vmem:[%s3136_s19] ss:$0 sm:$0xff]  ;;  %s2140_s19 = smov [#allocation29]  }
 0x5f3   :  { %828 = vrot.lane.b32.xlu0 %v690_v49, %s2136_s8  ;;  %s1553_s30 = sshll.u32 %s2140_s19, 4  ;;  %s1554_s30 = int_to_ptr.vmem [resolvable:$true] %s1553_s30 }
 0x5fa   :  { %v769_v56 = vpop.permute.xlu2 %768 }
 0x5fb   :  { %1319 = vrot.lane.b32.xlu0 %v1221_v55, %s2136_s8  ;;  %v770_v63 = vsel %vm3187_vm7, %v767_v26, %v769_v56  ;;  %v1541_v55 = vstv %s3191_s7 }
 0x602   :  { %v1247_v12 = vpop.permute.xlu2 %1246 }
 0x60a   :  { %v1274_v8 = vpop.permute.xlu1 %1273 }
 0x60b   :  { %v1275_v24 = vsel %vm3185_vm15, %v767_v26, %v1274_v8 }
 0x60c   :  { %1321 = vrot.lane.b32.xlu2 %v1275_v24, %s2135_s3 }
 0x611   :  { %v809_v57 = vpop.permute.xlu0 %808 }
 0x612   :  { %v1301_v60 = vpop.permute.xlu1 %1300  ;;  %v810_v61 = vsel %vm3186_vm1, %v807_v53, %v809_v57 }
 0x613   :  { %v1302_v3 = vsel %vm3188_vm8, %v807_v53, %v1301_v60  ;;  %832 = vrot.lane.b32.xlu0 %v810_v61, %s2137_s28 }
 0x614   :  { %830 = vrot.lane.b32.xlu2 %v770_v63, %s2135_s3  ;;  %1323 = vrot.lane.b32.xlu1 %v1302_v3, %s2137_s28 }
 0x61a   :  { %v727_v48 = vpop.permute.xlu1 %726 }
 0x61b   :  { %v1248_v39 = vsel %vm3189_vm9, %v727_v48, %v1247_v12 }
 0x622   :  { %v1411_v25 = vpop.f32.mrf.mxu3  ;;  %v729_v32 = vpop.permute.xlu1 %728 }
 0x623   :  { %v1412_v6 = vadd.f32 %v1684_v37, %v1411_v25  ;;  %v730_v14 = vsel %vm724_vm4, %v727_v48, %v729_v32 }
 0x625   :  { %v1414_v11 = vmax.f32 %v1412_v6, 0.0 }
 0x627   :  { %1650 = vmatmul.msk.f32.vlgmr.msrb.gmra.mxu1 %vm1349_vm5, %v1414_v11  ;;  %vm1335_vm5 = vcmask 517120  }
 0x665   :  { %v829_v30 = vpop.permute.xlu0 %828 }
 0x666   :  { %v1322_v22 = vpop.permute.xlu2 %1321  ;;  %v834_v10 = vsel %vm824_vm0, %v829_v30, %v730_v14 }
 0x66d   :  { %v1320_v36 = vpop.permute.xlu0 %1319 }
 0x66e   :  { %v1325_v41 = vsel %vm824_vm0, %v1320_v36, %v1248_v39  ;;  %v831_v7 = vpop.permute.xlu2 %830 }
 0x66f   :  { %v1326_v19 = vsel %vm651_vm6, %v1325_v41, %v1322_v22  ;;  %v835_v33 = vsel %vm651_vm6, %v834_v10, %v831_v7 }
 0x685   :  { %v833_v27 = vpop.permute.xlu0 %832 }
 0x686   :  { %v1324_v20 = vpop.permute.xlu1 %1323  ;;  %v836_v1 = vsel %vm406_vm2, %v835_v33, %v833_v27 }
 0x687   :  { %v1327_v43 = vsel %vm406_vm2, %v1326_v19, %v1324_v20  ;;  %vm1544_vm2 = vcmask 58368  }
 0x688   :  { %v1333_v42 = vrot.slane %v1327_v43, 7 }
 0x68a   :  { %v1334_v47 = vsel %vm1331_vm3, %v836_v1, %v1333_v42 }
 0x68b   :  { %1336 = vst.msk [vmem:[%s3141_s24] sm:$0x3] %vm1335_vm5, %v1334_v47 }
 0x6a4   :  { %v1447_v35 = vpop.f32.mrf.mxu1 }
 0x6a5   :  { %v1448_v52 = vadd.f32 %v1685_v29, %v1447_v35 }
 0x6a7   :  { %v1450_v62 = vmax.f32 %v1448_v52, 0.0 }
 0x6a9   :  { %1651 = vmatmul.msk.f32.vlgmr.msrb.gmra.mxu2 %vm651_vm6, %v1450_v62 }
 0x72c   :  { %v1479_v5 = vpop.f32.mrf.mxu2 }
 0x72d   :  { %v1480_v0 = vadd.f32 %v1686_v50, %v1479_v5 }
 0x72f   :  { %v1482_v23 = vmax.f32 %v1480_v0, 0.0 }
 0x731   :  { %1652 = vmatmul.msk.f32.vlgmr.msrb.gmra.mxu0 %vm824_vm0, %v1482_v23  ;;  %1653 = vmatmul.msk.f32.vlgmr.msra.gmra.mxu2 %vm824_vm0, %v1482_v23 }
 0x7ae   :  { %v1509_v40 = vpop.f32.mrf.mxu0 }
 0x7af   :  { %v1510_v18 = vadd.f32 %v1687_v31, %v1509_v40 }
 0x7b1   :  { %1546 = vst.msk [vmem:[#allocation30] sm:$0x3] %vm1544_vm2, %v1510_v18 }
 0x7b2   :  { %1569 = dma.vmem_to_hbm [thread:$0]  %s1565_s26, 32, %s1567_s23, [#allocation31]  }
 0x7b4   :  { %v1535_v49 = vpop.f32.mrf.mxu2 }
 0x7b5   :  { %v1536_v34 = vadd.f32 %v1688_v54, %v1535_v49 }
 0x7b7   :  { %v1538_v28 = vmul.f32 1.442695, %v1536_v34 }
 0x7b9   :  { %1689 = vpow2.f32 %v1538_v28 }
 0x7bf   :  { %v1690_v4 = vpop.eup %1689 }
 0x7c0   :  { %v1542_v58 = vmul.f32 %v1690_v4, %v1541_v55  ;;  %1547 = vst.msk [vmem:[#allocation32] sm:$0x3] %vm1544_vm2, %v1690_v4 }
 0x7c1   :  { %1580 = dma.vmem_to_hbm [thread:$0]  %s1576_s16, 32, %s1578_s29, [#allocation31]  }
 0x7c2   :  { %v1543_v59 = vadd.f32 %v1542_v58, %v1510_v18 }
 0x7c4   :  { %1545 = vst.msk [vmem:[#allocation29] sm:$0x3] %vm1544_vm2, %v1543_v59 }
 0x7c5   :  { %1558 = dma.vmem_to_hbm [thread:$0]  %s1554_s30, 32, %s1556_s1, [#allocation8]  }
 0x7c6   :  { %2115 = dma.done.wait [#allocation8], 32  }
 0x7c7   :  { %2116 = vsyncadd [#allocation8], 4294967264 }
 0x7c8   :  { %2117 = dma.done.wait [#allocation31], 64  }
 0x7c9   :  { %2118 = vsyncadd [#allocation31], 4294967232 }
 0x7ca   :  { %1597 = vsyncpa [#allocation7], 1 }
 0x7cb   :  { %1598 = vsyncpa [#allocation10], 1 }
 0x7cc   :  { %1599 = vsyncpa [#allocation13], 1 }
 0x7cd   :  { %1600 = vsyncpa [#allocation16], 1 }
 0x7ce   :  { %1601 = vsyncpa [#allocation19], 1 }
 0x7cf   :  { %1602 = vsyncpa [#allocation22], 1 }
 0x7d0   :  { %1603 = vsyncpa [#allocation25], 1 }
 0x7d1   :  { %1604 = vsyncpa [#allocation28], 1 }
 0x7d2   :  { %1605 = vsyncpa [#allocation8], 1 }
 0x7d3   :  { %1606 = vsyncpa [#allocation31], 1 }

</bundles_post_ra>
